<compile_context>
chip_gen: v7x
topology: tpu7x:2x2x1
jax: 0.10.0
libtpu: 0.0.40
codegen_flags: <defaults>
</compile_context>

<pallas_src>
import functools

import jax
import jax.numpy as jnp
import numpy as np
from jax.experimental import pallas as pl
from jax.experimental.pallas import tpu as pltpu

ACTION_SPACE = 6
SEQ_LEN = 8
N_CHAN = 6
C_CNN = 128
C_FC = 128
KERNEL_SIZE = 4
L1 = SEQ_LEN - KERNEL_SIZE + 1        # 5  (conv1 / conv2 output length)
L3 = ACTION_SPACE - KERNEL_SIZE + 1   # 3  (conv3 output length)
N_BLOCKS = L1 + L1 + L3 + 3           # 16
INCOMING = 2 * C_CNN * L1 + C_CNN * L3 + 3 * C_FC  # 2048

# Row layout of the packed [24, 128] small-parameter table.
ROW_WC = 0                            # 12 rows: conv weight tap, row = ci*4 + k
ROW_BC = ROW_WC + 3 * KERNEL_SIZE     # 3 rows: conv biases
ROW_WF = ROW_BC + 3                   # 3 rows: Linear(1,128) weights
ROW_BF = ROW_WF + 3                   # 3 rows: Linear(1,128) biases
ROW_BFC1 = ROW_BF + 3                 # 1 row : fc1 bias
ROW_WFC2 = ROW_BFC1 + 1               # 1 row : fc2 weight (as a row)
ROW_BFC2 = ROW_WFC2 + 1               # 1 row : fc2 bias (broadcast)
N_SP_ROWS = ROW_BFC2 + 1              # 24

DEFAULT_TB = 512                       # batch tile (MXU M dimension)


def _round_up(n, m):
    return ((n + m - 1) // m) * m


def critic_kernel(x_ref, sp_ref, wblk_ref, out_ref, feat_ref):
    TB = x_ref.shape[0]

    x = x_ref[...]            # [TB, 48] f32, flattened (channel, time): idx = c*8 + t
    sp = sp_ref[...]          # [24, 128] f32 packed small params

    def row(r):               # static sublane slice -> [1, 128]
        return sp[r:r + 1, :]

    # Hoisted lane-broadcasts of distinct x columns (JAX does not CSE
    # broadcast_in_dim; without this each column is broadcast up to 4x).
    xcol_cache = {}

    def xcol(col):
        v = xcol_cache.get(col)
        if v is None:
            v = jnp.broadcast_to(x[:, col:col + 1], (TB, C_CNN))
            xcol_cache[col] = v
        return v

    def store_block(blk, pre):
        # ReLU in f32 (VPU), cast to bf16, store at 128-aligned lane offset.
        feat_ref[:, blk * C_FC:(blk + 1) * C_FC] = (
            jnp.maximum(pre, 0.0).astype(feat_ref.dtype))

    blk = 0
    # conv paths: (conv_index, input channel, output length)
    for ci, chan, l_out in ((0, 2, L1), (1, 3, L1), (2, 4, L3)):
        # Hoist bias / tap sublane-broadcasts out of the per-(t, k) loops.
        bias_b = jnp.broadcast_to(row(ROW_BC + ci), (TB, C_CNN))
        taps_b = [jnp.broadcast_to(row(ROW_WC + ci * KERNEL_SIZE + k), (TB, C_CNN))
                  for k in range(KERNEL_SIZE)]
        base = chan * SEQ_LEN
        for t in range(l_out):
            pre = bias_b
            for k in range(KERNEL_SIZE):
                pre = pre + xcol(base + t + k) * taps_b[k]
            store_block(blk, pre)
            blk += 1

    # critic_fc_1/2/3 paths: Linear(1, 128) + ReLU on inputs[:, {0,1,5}, -1]
    for j, chan in enumerate((0, 1, 5)):
        col = chan * SEQ_LEN + (SEQ_LEN - 1)
        pre = x[:, col:col + 1] * row(ROW_WF + j) + row(ROW_BF + j)
        store_block(blk, pre)
        blk += 1

    # fc1: single [TB,2048] @ [2048,128] bf16 MXU matmul, f32 accumulate.
    # NOTE: correctness relies on all N_BLOCKS*128 feat columns being written
    # above every invocation (scratch persists across grid steps).
    acc = jnp.dot(feat_ref[...], wblk_ref[...],
                  preferred_element_type=jnp.float32)
    h = jnp.maximum(acc + row(ROW_BFC1), 0.0)                     # [TB, 128] f32

    # fc2: VPU multiply + lane reduction (avoid N=1 MXU matmul).
    red = jnp.sum(h * row(ROW_WFC2), axis=-1, keepdims=True)      # [TB, 1]
    out_ref[...] = red + sp[ROW_BFC2:ROW_BFC2 + 1, 0:1]


def build_fc1_packed(w_fc1):
    """Permute fc1 weight rows (PyTorch concat/flatten order) into the kernel's
    block-lane order: packed[blk*128 + c, :] is the fc1 row multiplying the
    feature of channel c in block blk (conv position t or small-fc path j)."""
    c = jnp.arange(C_CNN)
    rows = []
    off = 0
    for t in range(L1):                       # conv1 blocks
        rows.append(off + c * L1 + t)
    off += C_CNN * L1
    for t in range(L1):                       # conv2 blocks
        rows.append(off + c * L1 + t)
    off += C_CNN * L1
    for t in range(L3):                       # conv3 blocks
        rows.append(off + c * L3 + t)
    off += C_CNN * L3
    for j in range(3):                        # fc_1/2/3 blocks
        rows.append(off + j * C_FC + c)
    perm = jnp.concatenate(rows)              # (2048,)
    return w_fc1[perm]                        # (2048, 128)


def init_params(key):
    ks = jax.random.split(key, 8)
    scale = 0.1
    wc = scale * jax.random.normal(ks[0], (3, KERNEL_SIZE, C_CNN), jnp.float32)
    bc = scale * jax.random.normal(ks[1], (3, C_CNN), jnp.float32)
    wf = scale * jax.random.normal(ks[2], (3, C_FC), jnp.float32)
    bf = scale * jax.random.normal(ks[3], (3, C_FC), jnp.float32)
    # fc1.weight.T, rows in PyTorch in_feature (concat/flatten) order.
    w_fc1 = scale * jax.random.normal(ks[4], (INCOMING, C_FC), jnp.float32)
    bfc1 = scale * jax.random.normal(ks[5], (1, C_FC), jnp.float32)
    wfc2 = scale * jax.random.normal(ks[6], (C_FC, 1), jnp.float32)
    bfc2 = scale * jax.random.normal(ks[7], (1, 1), jnp.float32)
    return dict(wc=wc, bc=bc, wf=wf, bf=bf,
                w_fc1=w_fc1, bfc1=bfc1, wfc2=wfc2, bfc2=bfc2)


def pack_params(params):
    """One-time packing: [24,128] f32 small-param table + bf16 fc1 weight."""
    sp = jnp.concatenate([
        params['wc'].reshape(3 * KERNEL_SIZE, C_CNN),          # rows 0..11
        params['bc'],                                          # 12..14
        params['wf'],                                          # 15..17
        params['bf'],                                          # 18..20
        params['bfc1'],                                        # 21
        params['wfc2'].T,                                      # 22
        jnp.broadcast_to(params['bfc2'], (1, C_FC)),           # 23
    ], axis=0).astype(jnp.float32)
    wblk = build_fc1_packed(params['w_fc1']).astype(jnp.bfloat16)
    return sp, wblk


@functools.partial(jax.jit, static_argnames=("tb",))
def critic_forward(inputs, sp, wblk, tb=DEFAULT_TB):
    # inputs: [B, 6, 8] float32 (PyTorch NCL layout).
    B = inputs.shape[0]
    TB = min(tb, _round_up(max(B, 1), 8))      # batch tile (multiple of 8)
    Bp = _round_up(B, TB)                      # padded batch
    x2 = inputs.reshape(B, N_CHAN * SEQ_LEN)   # free contiguous reshape
    if Bp != B:
        x2 = jnp.pad(x2, ((0, Bp - B), (0, 0)))

    out = pl.pallas_call(
        critic_kernel,
        out_shape=jax.ShapeDtypeStruct((Bp, 1), jnp.float32),
        grid_spec=pltpu.PrefetchScalarGridSpec(
            num_scalar_prefetch=0,
            grid=(Bp // TB,),
            in_specs=[
                # batch-tiled input: double-buffered, overlaps the MXU work
                pl.BlockSpec((TB, N_CHAN * SEQ_LEN), lambda i: (i, 0)),
                # small-param table: constant index_map -> VMEM-resident
                pl.BlockSpec((N_SP_ROWS, C_CNN), lambda i: (0, 0)),
                # fc1 weight: constant index_map -> VMEM-resident
                pl.BlockSpec((INCOMING, C_FC), lambda i: (0, 0)),
            ],
            out_specs=pl.BlockSpec((TB, 1), lambda i: (i, 0)),
            scratch_shapes=[pltpu.VMEM((TB, N_BLOCKS * C_FC), jnp.bfloat16)],
        ),
        compiler_params=pltpu.CompilerParams(
            dimension_semantics=("parallel",),
            vmem_limit_bytes=32 * 1024 * 1024),
    )(x2, sp, wblk)

    return out[:B] if Bp != B else out


def critic_reference(inputs, params):
    """Pure-JAX reference reproducing the PyTorch forward semantics (f32)."""
    B = inputs.shape[0]

    def conv(x, ci):  # x: [B, L_in] (the single input channel)
        l_out = x.shape[1] - KERNEL_SIZE + 1
        cols = []
        for t in range(l_out):
            pre = params['bc'][ci][None, :] + sum(
                x[:, t + k:t + k + 1] * params['wc'][ci, k][None, :]
                for k in range(KERNEL_SIZE))
            cols.append(jnp.maximum(pre, 0.0))
        y = jnp.stack(cols, axis=2)       # [B, 128, L_out]  (channel, time)
        return y.reshape(B, -1)           # PyTorch flatten: index = c*L_out + t

    x1 = conv(inputs[:, 2, :], 0)
    x2 = conv(inputs[:, 3, :], 1)
    x3 = conv(inputs[:, 4, :ACTION_SPACE], 2)

    def fc_small(v, j):
        return jnp.maximum(
            v[:, None] * params['wf'][j][None, :] + params['bf'][j][None, :], 0.0)

    x4 = fc_small(inputs[:, 0, -1], 0)
    x5 = fc_small(inputs[:, 1, -1], 1)
    x6 = fc_small(inputs[:, 5, -1], 2)

    x = jnp.concatenate([x1, x2, x3, x4, x5, x6], axis=1)  # [B, 2048]
    h = jnp.maximum(
        jnp.dot(x, params['w_fc1'], precision=jax.lax.Precision.HIGHEST)
        + params['bfc1'], 0.0)
    return jnp.dot(h, params['wfc2'],
                   precision=jax.lax.Precision.HIGHEST) + params['bfc2']


if __name__ == "__main__":
    key = jax.random.PRNGKey(0)
    pkey, xkey, xkey2 = jax.random.split(key, 3)
    params = init_params(pkey)
    sp, wblk = pack_params(params)

    # Small-batch check (B=2): single grid step, padded up to a tile of 8 rows.
    B = 2
    inputs = jax.random.normal(xkey, (B, N_CHAN, SEQ_LEN), dtype=jnp.float32)
    out = critic_forward(inputs, sp, wblk)
    jax.block_until_ready(out)
    ref = critic_reference(inputs, params)
    assert out.shape == (B, 1)
    # Tolerance: the kernel's fc1 matmul runs in bf16 (f32 accumulate), the
    # reference in f32 HIGHEST.
    np.testing.assert_allclose(np.asarray(out), np.asarray(ref),
                               rtol=2e-2, atol=2e-2)

    # Multi-tile check: exercises the batch grid (2 grid steps) + padding.
    B2 = 520
    inputs2 = jax.random.normal(xkey2, (B2, N_CHAN, SEQ_LEN), dtype=jnp.float32)
    out2 = critic_forward(inputs2, sp, wblk)
    jax.block_until_ready(out2)
    ref2 = critic_reference(inputs2, params)
    assert out2.shape == (B2, 1)
    np.testing.assert_allclose(np.asarray(out2), np.asarray(ref2),
                               rtol=2e-2, atol=2e-2)

    print("KERNEL_OK")
</pallas_src>

<mosaic_0001>
module attributes {stable_mosaic.version = 11 : i64} {
  func.func @critic_kernel(%arg0: i32, %arg1: memref<8x48xf32, #tpu.memory_space<vmem>>, %arg2: memref<24x128xf32, #tpu.memory_space<vmem>>, %arg3: memref<2048x128xbf16, #tpu.memory_space<vmem>>, %arg4: memref<8x1xf32, #tpu.memory_space<vmem>>, %arg5: memref<8x2048xbf16, #tpu.memory_space<vmem>>) attributes {dimension_semantics = [#tpu.dimension_semantics<parallel>], iteration_bounds = array<i64: 1>, scalar_prefetch = 0 : i64, scratch_operands = 1 : i64, tpu.core_type = #tpu.core_type<tc>, window_params = [{transform_indices = @transform_0, window_bounds = array<i64: 8, 48>}, {pipeline_mode = #tpu.pipeline_mode<synchronous>, transform_indices = @transform_1, window_bounds = array<i64: 24, 128>}, {pipeline_mode = #tpu.pipeline_mode<synchronous>, transform_indices = @transform_2, window_bounds = array<i64: 2048, 128>}, {transform_indices = @transform_3, window_bounds = array<i64: 8, 1>}]} {
    %c0 = arith.constant 0 : index
    %c0_0 = arith.constant 0 : index
    %0 = vector.load %arg1[%c0, %c0_0] : memref<8x48xf32, #tpu.memory_space<vmem>>, vector<8x48xf32>
    %c0_1 = arith.constant 0 : index
    %c0_2 = arith.constant 0 : index
    %1 = vector.load %arg2[%c0_1, %c0_2] : memref<24x128xf32, #tpu.memory_space<vmem>>, vector<24x128xf32>
    %2 = vector.extract_strided_slice %1 {offsets = [12, 0], sizes = [1, 128], strides = [1, 1]} : vector<24x128xf32> to vector<1x128xf32>
    %3 = vector.shape_cast %2 : vector<1x128xf32> to vector<1x128xf32>
    %4 = vector.broadcast %3 : vector<1x128xf32> to vector<8x128xf32>
    %5 = vector.extract_strided_slice %1 {offsets = [0, 0], sizes = [1, 128], strides = [1, 1]} : vector<24x128xf32> to vector<1x128xf32>
    %6 = vector.shape_cast %5 : vector<1x128xf32> to vector<1x128xf32>
    %7 = vector.broadcast %6 : vector<1x128xf32> to vector<8x128xf32>
    %8 = vector.extract_strided_slice %1 {offsets = [1, 0], sizes = [1, 128], strides = [1, 1]} : vector<24x128xf32> to vector<1x128xf32>
    %9 = vector.shape_cast %8 : vector<1x128xf32> to vector<1x128xf32>
    %10 = vector.broadcast %9 : vector<1x128xf32> to vector<8x128xf32>
    %11 = vector.extract_strided_slice %1 {offsets = [2, 0], sizes = [1, 128], strides = [1, 1]} : vector<24x128xf32> to vector<1x128xf32>
    %12 = vector.shape_cast %11 : vector<1x128xf32> to vector<1x128xf32>
    %13 = vector.broadcast %12 : vector<1x128xf32> to vector<8x128xf32>
    %14 = vector.extract_strided_slice %1 {offsets = [3, 0], sizes = [1, 128], strides = [1, 1]} : vector<24x128xf32> to vector<1x128xf32>
    %15 = vector.shape_cast %14 : vector<1x128xf32> to vector<1x128xf32>
    %16 = vector.broadcast %15 : vector<1x128xf32> to vector<8x128xf32>
    %17 = vector.extract_strided_slice %0 {offsets = [0, 16], sizes = [8, 1], strides = [1, 1]} : vector<8x48xf32> to vector<8x1xf32>
    %18 = vector.shape_cast %17 : vector<8x1xf32> to vector<8x1xf32>
    %19 = vector.broadcast %18 : vector<8x1xf32> to vector<8x128xf32>
    %20 = arith.mulf %19, %7 : vector<8x128xf32>
    %21 = arith.addf %4, %20 : vector<8x128xf32>
    %22 = vector.extract_strided_slice %0 {offsets = [0, 17], sizes = [8, 1], strides = [1, 1]} : vector<8x48xf32> to vector<8x1xf32>
    %23 = vector.shape_cast %22 : vector<8x1xf32> to vector<8x1xf32>
    %24 = vector.broadcast %23 : vector<8x1xf32> to vector<8x128xf32>
    %25 = arith.mulf %24, %10 : vector<8x128xf32>
    %26 = arith.addf %21, %25 : vector<8x128xf32>
    %27 = vector.extract_strided_slice %0 {offsets = [0, 18], sizes = [8, 1], strides = [1, 1]} : vector<8x48xf32> to vector<8x1xf32>
    %28 = vector.shape_cast %27 : vector<8x1xf32> to vector<8x1xf32>
    %29 = vector.broadcast %28 : vector<8x1xf32> to vector<8x128xf32>
    %30 = arith.mulf %29, %13 : vector<8x128xf32>
    %31 = arith.addf %26, %30 : vector<8x128xf32>
    %32 = vector.extract_strided_slice %0 {offsets = [0, 19], sizes = [8, 1], strides = [1, 1]} : vector<8x48xf32> to vector<8x1xf32>
    %33 = vector.shape_cast %32 : vector<8x1xf32> to vector<8x1xf32>
    %34 = vector.broadcast %33 : vector<8x1xf32> to vector<8x128xf32>
    %35 = arith.mulf %34, %16 : vector<8x128xf32>
    %36 = arith.addf %31, %35 : vector<8x128xf32>
    %cst = arith.constant 0.000000e+00 : f32
    %37 = vector.broadcast %cst : f32 to vector<8x128xf32>
    %38 = arith.maximumf %36, %37 : vector<8x128xf32>
    %39 = arith.truncf %38 : vector<8x128xf32> to vector<8x128xbf16>
    %c0_3 = arith.constant 0 : index
    %c0_4 = arith.constant 0 : index
    %40 = vector.load %arg5[%c0_3, %c0_4] : memref<8x2048xbf16, #tpu.memory_space<vmem>>, vector<8x128xbf16>
    tpu.vector_store %arg5[%c0_3, %c0_4], %39 {strides = array<i32>} : memref<8x2048xbf16, #tpu.memory_space<vmem>>, vector<8x128xbf16>,
    %41 = arith.mulf %24, %7 : vector<8x128xf32>
    %42 = arith.addf %4, %41 : vector<8x128xf32>
    %43 = arith.mulf %29, %10 : vector<8x128xf32>
    %44 = arith.addf %42, %43 : vector<8x128xf32>
    %45 = arith.mulf %34, %13 : vector<8x128xf32>
    %46 = arith.addf %44, %45 : vector<8x128xf32>
    %47 = vector.extract_strided_slice %0 {offsets = [0, 20], sizes = [8, 1], strides = [1, 1]} : vector<8x48xf32> to vector<8x1xf32>
    %48 = vector.shape_cast %47 : vector<8x1xf32> to vector<8x1xf32>
    %49 = vector.broadcast %48 : vector<8x1xf32> to vector<8x128xf32>
    %50 = arith.mulf %49, %16 : vector<8x128xf32>
    %51 = arith.addf %46, %50 : vector<8x128xf32>
    %cst_5 = arith.constant 0.000000e+00 : f32
    %52 = vector.broadcast %cst_5 : f32 to vector<8x128xf32>
    %53 = arith.maximumf %51, %52 : vector<8x128xf32>
    %54 = arith.truncf %53 : vector<8x128xf32> to vector<8x128xbf16>
    %c0_6 = arith.constant 0 : index
    %c128 = arith.constant 128 : index
    %55 = vector.load %arg5[%c0_6, %c128] : memref<8x2048xbf16, #tpu.memory_space<vmem>>, vector<8x128xbf16>
    tpu.vector_store %arg5[%c0_6, %c128], %54 {strides = array<i32>} : memref<8x2048xbf16, #tpu.memory_space<vmem>>, vector<8x128xbf16>,
    %56 = arith.mulf %29, %7 : vector<8x128xf32>
    %57 = arith.addf %4, %56 : vector<8x128xf32>
    %58 = arith.mulf %34, %10 : vector<8x128xf32>
    %59 = arith.addf %57, %58 : vector<8x128xf32>
    %60 = arith.mulf %49, %13 : vector<8x128xf32>
    %61 = arith.addf %59, %60 : vector<8x128xf32>
    %62 = vector.extract_strided_slice %0 {offsets = [0, 21], sizes = [8, 1], strides = [1, 1]} : vector<8x48xf32> to vector<8x1xf32>
    %63 = vector.shape_cast %62 : vector<8x1xf32> to vector<8x1xf32>
    %64 = vector.broadcast %63 : vector<8x1xf32> to vector<8x128xf32>
    %65 = arith.mulf %64, %16 : vector<8x128xf32>
    %66 = arith.addf %61, %65 : vector<8x128xf32>
    %cst_7 = arith.constant 0.000000e+00 : f32
    %67 = vector.broadcast %cst_7 : f32 to vector<8x128xf32>
    %68 = arith.maximumf %66, %67 : vector<8x128xf32>
    %69 = arith.truncf %68 : vector<8x128xf32> to vector<8x128xbf16>
    %c0_8 = arith.constant 0 : index
    %c256 = arith.constant 256 : index
    %70 = vector.load %arg5[%c0_8, %c256] : memref<8x2048xbf16, #tpu.memory_space<vmem>>, vector<8x128xbf16>
    tpu.vector_store %arg5[%c0_8, %c256], %69 {strides = array<i32>} : memref<8x2048xbf16, #tpu.memory_space<vmem>>, vector<8x128xbf16>,
    %71 = arith.mulf %34, %7 : vector<8x128xf32>
    %72 = arith.addf %4, %71 : vector<8x128xf32>
    %73 = arith.mulf %49, %10 : vector<8x128xf32>
    %74 = arith.addf %72, %73 : vector<8x128xf32>
    %75 = arith.mulf %64, %13 : vector<8x128xf32>
    %76 = arith.addf %74, %75 : vector<8x128xf32>
    %77 = vector.extract_strided_slice %0 {offsets = [0, 22], sizes = [8, 1], strides = [1, 1]} : vector<8x48xf32> to vector<8x1xf32>
    %78 = vector.shape_cast %77 : vector<8x1xf32> to vector<8x1xf32>
    %79 = vector.broadcast %78 : vector<8x1xf32> to vector<8x128xf32>
    %80 = arith.mulf %79, %16 : vector<8x128xf32>
    %81 = arith.addf %76, %80 : vector<8x128xf32>
    %cst_9 = arith.constant 0.000000e+00 : f32
    %82 = vector.broadcast %cst_9 : f32 to vector<8x128xf32>
    %83 = arith.maximumf %81, %82 : vector<8x128xf32>
    %84 = arith.truncf %83 : vector<8x128xf32> to vector<8x128xbf16>
    %c0_10 = arith.constant 0 : index
    %c384 = arith.constant 384 : index
    %85 = vector.load %arg5[%c0_10, %c384] : memref<8x2048xbf16, #tpu.memory_space<vmem>>, vector<8x128xbf16>
    tpu.vector_store %arg5[%c0_10, %c384], %84 {strides = array<i32>} : memref<8x2048xbf16, #tpu.memory_space<vmem>>, vector<8x128xbf16>,
    %86 = arith.mulf %49, %7 : vector<8x128xf32>
    %87 = arith.addf %4, %86 : vector<8x128xf32>
    %88 = arith.mulf %64, %10 : vector<8x128xf32>
    %89 = arith.addf %87, %88 : vector<8x128xf32>
    %90 = arith.mulf %79, %13 : vector<8x128xf32>
    %91 = arith.addf %89, %90 : vector<8x128xf32>
    %92 = vector.extract_strided_slice %0 {offsets = [0, 23], sizes = [8, 1], strides = [1, 1]} : vector<8x48xf32> to vector<8x1xf32>
    %93 = vector.shape_cast %92 : vector<8x1xf32> to vector<8x1xf32>
    %94 = vector.broadcast %93 : vector<8x1xf32> to vector<8x128xf32>
    %95 = arith.mulf %94, %16 : vector<8x128xf32>
    %96 = arith.addf %91, %95 : vector<8x128xf32>
    %cst_11 = arith.constant 0.000000e+00 : f32
    %97 = vector.broadcast %cst_11 : f32 to vector<8x128xf32>
    %98 = arith.maximumf %96, %97 : vector<8x128xf32>
    %99 = arith.truncf %98 : vector<8x128xf32> to vector<8x128xbf16>
    %c0_12 = arith.constant 0 : index
    %c512 = arith.constant 512 : index
    %100 = vector.load %arg5[%c0_12, %c512] : memref<8x2048xbf16, #tpu.memory_space<vmem>>, vector<8x128xbf16>
    tpu.vector_store %arg5[%c0_12, %c512], %99 {strides = array<i32>} : memref<8x2048xbf16, #tpu.memory_space<vmem>>, vector<8x128xbf16>,
    %101 = vector.extract_strided_slice %1 {offsets = [13, 0], sizes = [1, 128], strides = [1, 1]} : vector<24x128xf32> to vector<1x128xf32>
    %102 = vector.shape_cast %101 : vector<1x128xf32> to vector<1x128xf32>
    %103 = vector.broadcast %102 : vector<1x128xf32> to vector<8x128xf32>
    %104 = vector.extract_strided_slice %1 {offsets = [4, 0], sizes = [1, 128], strides = [1, 1]} : vector<24x128xf32> to vector<1x128xf32>
    %105 = vector.shape_cast %104 : vector<1x128xf32> to vector<1x128xf32>
    %106 = vector.broadcast %105 : vector<1x128xf32> to vector<8x128xf32>
    %107 = vector.extract_strided_slice %1 {offsets = [5, 0], sizes = [1, 128], strides = [1, 1]} : vector<24x128xf32> to vector<1x128xf32>
    %108 = vector.shape_cast %107 : vector<1x128xf32> to vector<1x128xf32>
    %109 = vector.broadcast %108 : vector<1x128xf32> to vector<8x128xf32>
    %110 = vector.extract_strided_slice %1 {offsets = [6, 0], sizes = [1, 128], strides = [1, 1]} : vector<24x128xf32> to vector<1x128xf32>
    %111 = vector.shape_cast %110 : vector<1x128xf32> to vector<1x128xf32>
    %112 = vector.broadcast %111 : vector<1x128xf32> to vector<8x128xf32>
    %113 = vector.extract_strided_slice %1 {offsets = [7, 0], sizes = [1, 128], strides = [1, 1]} : vector<24x128xf32> to vector<1x128xf32>
    %114 = vector.shape_cast %113 : vector<1x128xf32> to vector<1x128xf32>
    %115 = vector.broadcast %114 : vector<1x128xf32> to vector<8x128xf32>
    %116 = vector.extract_strided_slice %0 {offsets = [0, 24], sizes = [8, 1], strides = [1, 1]} : vector<8x48xf32> to vector<8x1xf32>
    %117 = vector.shape_cast %116 : vector<8x1xf32> to vector<8x1xf32>
    %118 = vector.broadcast %117 : vector<8x1xf32> to vector<8x128xf32>
    %119 = arith.mulf %118, %106 : vector<8x128xf32>
    %120 = arith.addf %103, %119 : vector<8x128xf32>
    %121 = vector.extract_strided_slice %0 {offsets = [0, 25], sizes = [8, 1], strides = [1, 1]} : vector<8x48xf32> to vector<8x1xf32>
    %122 = vector.shape_cast %121 : vector<8x1xf32> to vector<8x1xf32>
    %123 = vector.broadcast %122 : vector<8x1xf32> to vector<8x128xf32>
    %124 = arith.mulf %123, %109 : vector<8x128xf32>
    %125 = arith.addf %120, %124 : vector<8x128xf32>
    %126 = vector.extract_strided_slice %0 {offsets = [0, 26], sizes = [8, 1], strides = [1, 1]} : vector<8x48xf32> to vector<8x1xf32>
    %127 = vector.shape_cast %126 : vector<8x1xf32> to vector<8x1xf32>
    %128 = vector.broadcast %127 : vector<8x1xf32> to vector<8x128xf32>
    %129 = arith.mulf %128, %112 : vector<8x128xf32>
    %130 = arith.addf %125, %129 : vector<8x128xf32>
    %131 = vector.extract_strided_slice %0 {offsets = [0, 27], sizes = [8, 1], strides = [1, 1]} : vector<8x48xf32> to vector<8x1xf32>
    %132 = vector.shape_cast %131 : vector<8x1xf32> to vector<8x1xf32>
    %133 = vector.broadcast %132 : vector<8x1xf32> to vector<8x128xf32>
    %134 = arith.mulf %133, %115 : vector<8x128xf32>
    %135 = arith.addf %130, %134 : vector<8x128xf32>
    %cst_13 = arith.constant 0.000000e+00 : f32
    %136 = vector.broadcast %cst_13 : f32 to vector<8x128xf32>
    %137 = arith.maximumf %135, %136 : vector<8x128xf32>
    %138 = arith.truncf %137 : vector<8x128xf32> to vector<8x128xbf16>
    %c0_14 = arith.constant 0 : index
    %c640 = arith.constant 640 : index
    %139 = vector.load %arg5[%c0_14, %c640] : memref<8x2048xbf16, #tpu.memory_space<vmem>>, vector<8x128xbf16>
    tpu.vector_store %arg5[%c0_14, %c640], %138 {strides = array<i32>} : memref<8x2048xbf16, #tpu.memory_space<vmem>>, vector<8x128xbf16>,
    %140 = arith.mulf %123, %106 : vector<8x128xf32>
    %141 = arith.addf %103, %140 : vector<8x128xf32>
    %142 = arith.mulf %128, %109 : vector<8x128xf32>
    %143 = arith.addf %141, %142 : vector<8x128xf32>
    %144 = arith.mulf %133, %112 : vector<8x128xf32>
    %145 = arith.addf %143, %144 : vector<8x128xf32>
    %146 = vector.extract_strided_slice %0 {offsets = [0, 28], sizes = [8, 1], strides = [1, 1]} : vector<8x48xf32> to vector<8x1xf32>
    %147 = vector.shape_cast %146 : vector<8x1xf32> to vector<8x1xf32>
    %148 = vector.broadcast %147 : vector<8x1xf32> to vector<8x128xf32>
    %149 = arith.mulf %148, %115 : vector<8x128xf32>
    %150 = arith.addf %145, %149 : vector<8x128xf32>
    %cst_15 = arith.constant 0.000000e+00 : f32
    %151 = vector.broadcast %cst_15 : f32 to vector<8x128xf32>
    %152 = arith.maximumf %150, %151 : vector<8x128xf32>
    %153 = arith.truncf %152 : vector<8x128xf32> to vector<8x128xbf16>
    %c0_16 = arith.constant 0 : index
    %c768 = arith.constant 768 : index
    %154 = vector.load %arg5[%c0_16, %c768] : memref<8x2048xbf16, #tpu.memory_space<vmem>>, vector<8x128xbf16>
    tpu.vector_store %arg5[%c0_16, %c768], %153 {strides = array<i32>} : memref<8x2048xbf16, #tpu.memory_space<vmem>>, vector<8x128xbf16>,
    %155 = arith.mulf %128, %106 : vector<8x128xf32>
    %156 = arith.addf %103, %155 : vector<8x128xf32>
    %157 = arith.mulf %133, %109 : vector<8x128xf32>
    %158 = arith.addf %156, %157 : vector<8x128xf32>
    %159 = arith.mulf %148, %112 : vector<8x128xf32>
    %160 = arith.addf %158, %159 : vector<8x128xf32>
    %161 = vector.extract_strided_slice %0 {offsets = [0, 29], sizes = [8, 1], strides = [1, 1]} : vector<8x48xf32> to vector<8x1xf32>
    %162 = vector.shape_cast %161 : vector<8x1xf32> to vector<8x1xf32>
    %163 = vector.broadcast %162 : vector<8x1xf32> to vector<8x128xf32>
    %164 = arith.mulf %163, %115 : vector<8x128xf32>
    %165 = arith.addf %160, %164 : vector<8x128xf32>
    %cst_17 = arith.constant 0.000000e+00 : f32
    %166 = vector.broadcast %cst_17 : f32 to vector<8x128xf32>
    %167 = arith.maximumf %165, %166 : vector<8x128xf32>
    %168 = arith.truncf %167 : vector<8x128xf32> to vector<8x128xbf16>
    %c0_18 = arith.constant 0 : index
    %c896 = arith.constant 896 : index
    %169 = vector.load %arg5[%c0_18, %c896] : memref<8x2048xbf16, #tpu.memory_space<vmem>>, vector<8x128xbf16>
    tpu.vector_store %arg5[%c0_18, %c896], %168 {strides = array<i32>} : memref<8x2048xbf16, #tpu.memory_space<vmem>>, vector<8x128xbf16>,
    %170 = arith.mulf %133, %106 : vector<8x128xf32>
    %171 = arith.addf %103, %170 : vector<8x128xf32>
    %172 = arith.mulf %148, %109 : vector<8x128xf32>
    %173 = arith.addf %171, %172 : vector<8x128xf32>
    %174 = arith.mulf %163, %112 : vector<8x128xf32>
    %175 = arith.addf %173, %174 : vector<8x128xf32>
    %176 = vector.extract_strided_slice %0 {offsets = [0, 30], sizes = [8, 1], strides = [1, 1]} : vector<8x48xf32> to vector<8x1xf32>
    %177 = vector.shape_cast %176 : vector<8x1xf32> to vector<8x1xf32>
    %178 = vector.broadcast %177 : vector<8x1xf32> to vector<8x128xf32>
    %179 = arith.mulf %178, %115 : vector<8x128xf32>
    %180 = arith.addf %175, %179 : vector<8x128xf32>
    %cst_19 = arith.constant 0.000000e+00 : f32
    %181 = vector.broadcast %cst_19 : f32 to vector<8x128xf32>
    %182 = arith.maximumf %180, %181 : vector<8x128xf32>
    %183 = arith.truncf %182 : vector<8x128xf32> to vector<8x128xbf16>
    %c0_20 = arith.constant 0 : index
    %c1024 = arith.constant 1024 : index
    %184 = vector.load %arg5[%c0_20, %c1024] : memref<8x2048xbf16, #tpu.memory_space<vmem>>, vector<8x128xbf16>
    tpu.vector_store %arg5[%c0_20, %c1024], %183 {strides = array<i32>} : memref<8x2048xbf16, #tpu.memory_space<vmem>>, vector<8x128xbf16>,
    %185 = arith.mulf %148, %106 : vector<8x128xf32>
    %186 = arith.addf %103, %185 : vector<8x128xf32>
    %187 = arith.mulf %163, %109 : vector<8x128xf32>
    %188 = arith.addf %186, %187 : vector<8x128xf32>
    %189 = arith.mulf %178, %112 : vector<8x128xf32>
    %190 = arith.addf %188, %189 : vector<8x128xf32>
    %191 = vector.extract_strided_slice %0 {offsets = [0, 31], sizes = [8, 1], strides = [1, 1]} : vector<8x48xf32> to vector<8x1xf32>
    %192 = vector.shape_cast %191 : vector<8x1xf32> to vector<8x1xf32>
    %193 = vector.broadcast %192 : vector<8x1xf32> to vector<8x128xf32>
    %194 = arith.mulf %193, %115 : vector<8x128xf32>
    %195 = arith.addf %190, %194 : vector<8x128xf32>
    %cst_21 = arith.constant 0.000000e+00 : f32
    %196 = vector.broadcast %cst_21 : f32 to vector<8x128xf32>
    %197 = arith.maximumf %195, %196 : vector<8x128xf32>
    %198 = arith.truncf %197 : vector<8x128xf32> to vector<8x128xbf16>
    %c0_22 = arith.constant 0 : index
    %c1152 = arith.constant 1152 : index
    %199 = vector.load %arg5[%c0_22, %c1152] : memref<8x2048xbf16, #tpu.memory_space<vmem>>, vector<8x128xbf16>
    tpu.vector_store %arg5[%c0_22, %c1152], %198 {strides = array<i32>} : memref<8x2048xbf16, #tpu.memory_space<vmem>>, vector<8x128xbf16>,
    %200 = vector.extract_strided_slice %1 {offsets = [14, 0], sizes = [1, 128], strides = [1, 1]} : vector<24x128xf32> to vector<1x128xf32>
    %201 = vector.shape_cast %200 : vector<1x128xf32> to vector<1x128xf32>
    %202 = vector.broadcast %201 : vector<1x128xf32> to vector<8x128xf32>
    %203 = vector.extract_strided_slice %1 {offsets = [8, 0], sizes = [1, 128], strides = [1, 1]} : vector<24x128xf32> to vector<1x128xf32>
    %204 = vector.shape_cast %203 : vector<1x128xf32> to vector<1x128xf32>
    %205 = vector.broadcast %204 : vector<1x128xf32> to vector<8x128xf32>
    %206 = vector.extract_strided_slice %1 {offsets = [9, 0], sizes = [1, 128], strides = [1, 1]} : vector<24x128xf32> to vector<1x128xf32>
    %207 = vector.shape_cast %206 : vector<1x128xf32> to vector<1x128xf32>
    %208 = vector.broadcast %207 : vector<1x128xf32> to vector<8x128xf32>
    %209 = vector.extract_strided_slice %1 {offsets = [10, 0], sizes = [1, 128], strides = [1, 1]} : vector<24x128xf32> to vector<1x128xf32>
    %210 = vector.shape_cast %209 : vector<1x128xf32> to vector<1x128xf32>
    %211 = vector.broadcast %210 : vector<1x128xf32> to vector<8x128xf32>
    %212 = vector.extract_strided_slice %1 {offsets = [11, 0], sizes = [1, 128], strides = [1, 1]} : vector<24x128xf32> to vector<1x128xf32>
    %213 = vector.shape_cast %212 : vector<1x128xf32> to vector<1x128xf32>
    %214 = vector.broadcast %213 : vector<1x128xf32> to vector<8x128xf32>
    %215 = vector.extract_strided_slice %0 {offsets = [0, 32], sizes = [8, 1], strides = [1, 1]} : vector<8x48xf32> to vector<8x1xf32>
    %216 = vector.shape_cast %215 : vector<8x1xf32> to vector<8x1xf32>
    %217 = vector.broadcast %216 : vector<8x1xf32> to vector<8x128xf32>
    %218 = arith.mulf %217, %205 : vector<8x128xf32>
    %219 = arith.addf %202, %218 : vector<8x128xf32>
    %220 = vector.extract_strided_slice %0 {offsets = [0, 33], sizes = [8, 1], strides = [1, 1]} : vector<8x48xf32> to vector<8x1xf32>
    %221 = vector.shape_cast %220 : vector<8x1xf32> to vector<8x1xf32>
    %222 = vector.broadcast %221 : vector<8x1xf32> to vector<8x128xf32>
    %223 = arith.mulf %222, %208 : vector<8x128xf32>
    %224 = arith.addf %219, %223 : vector<8x128xf32>
    %225 = vector.extract_strided_slice %0 {offsets = [0, 34], sizes = [8, 1], strides = [1, 1]} : vector<8x48xf32> to vector<8x1xf32>
    %226 = vector.shape_cast %225 : vector<8x1xf32> to vector<8x1xf32>
    %227 = vector.broadcast %226 : vector<8x1xf32> to vector<8x128xf32>
    %228 = arith.mulf %227, %211 : vector<8x128xf32>
    %229 = arith.addf %224, %228 : vector<8x128xf32>
    %230 = vector.extract_strided_slice %0 {offsets = [0, 35], sizes = [8, 1], strides = [1, 1]} : vector<8x48xf32> to vector<8x1xf32>
    %231 = vector.shape_cast %230 : vector<8x1xf32> to vector<8x1xf32>
    %232 = vector.broadcast %231 : vector<8x1xf32> to vector<8x128xf32>
    %233 = arith.mulf %232, %214 : vector<8x128xf32>
    %234 = arith.addf %229, %233 : vector<8x128xf32>
    %cst_23 = arith.constant 0.000000e+00 : f32
    %235 = vector.broadcast %cst_23 : f32 to vector<8x128xf32>
    %236 = arith.maximumf %234, %235 : vector<8x128xf32>
    %237 = arith.truncf %236 : vector<8x128xf32> to vector<8x128xbf16>
    %c0_24 = arith.constant 0 : index
    %c1280 = arith.constant 1280 : index
    %238 = vector.load %arg5[%c0_24, %c1280] : memref<8x2048xbf16, #tpu.memory_space<vmem>>, vector<8x128xbf16>
    tpu.vector_store %arg5[%c0_24, %c1280], %237 {strides = array<i32>} : memref<8x2048xbf16, #tpu.memory_space<vmem>>, vector<8x128xbf16>,
    %239 = arith.mulf %222, %205 : vector<8x128xf32>
    %240 = arith.addf %202, %239 : vector<8x128xf32>
    %241 = arith.mulf %227, %208 : vector<8x128xf32>
    %242 = arith.addf %240, %241 : vector<8x128xf32>
    %243 = arith.mulf %232, %211 : vector<8x128xf32>
    %244 = arith.addf %242, %243 : vector<8x128xf32>
    %245 = vector.extract_strided_slice %0 {offsets = [0, 36], sizes = [8, 1], strides = [1, 1]} : vector<8x48xf32> to vector<8x1xf32>
    %246 = vector.shape_cast %245 : vector<8x1xf32> to vector<8x1xf32>
    %247 = vector.broadcast %246 : vector<8x1xf32> to vector<8x128xf32>
    %248 = arith.mulf %247, %214 : vector<8x128xf32>
    %249 = arith.addf %244, %248 : vector<8x128xf32>
    %cst_25 = arith.constant 0.000000e+00 : f32
    %250 = vector.broadcast %cst_25 : f32 to vector<8x128xf32>
    %251 = arith.maximumf %249, %250 : vector<8x128xf32>
    %252 = arith.truncf %251 : vector<8x128xf32> to vector<8x128xbf16>
    %c0_26 = arith.constant 0 : index
    %c1408 = arith.constant 1408 : index
    %253 = vector.load %arg5[%c0_26, %c1408] : memref<8x2048xbf16, #tpu.memory_space<vmem>>, vector<8x128xbf16>
    tpu.vector_store %arg5[%c0_26, %c1408], %252 {strides = array<i32>} : memref<8x2048xbf16, #tpu.memory_space<vmem>>, vector<8x128xbf16>,
    %254 = arith.mulf %227, %205 : vector<8x128xf32>
    %255 = arith.addf %202, %254 : vector<8x128xf32>
    %256 = arith.mulf %232, %208 : vector<8x128xf32>
    %257 = arith.addf %255, %256 : vector<8x128xf32>
    %258 = arith.mulf %247, %211 : vector<8x128xf32>
    %259 = arith.addf %257, %258 : vector<8x128xf32>
    %260 = vector.extract_strided_slice %0 {offsets = [0, 37], sizes = [8, 1], strides = [1, 1]} : vector<8x48xf32> to vector<8x1xf32>
    %261 = vector.shape_cast %260 : vector<8x1xf32> to vector<8x1xf32>
    %262 = vector.broadcast %261 : vector<8x1xf32> to vector<8x128xf32>
    %263 = arith.mulf %262, %214 : vector<8x128xf32>
    %264 = arith.addf %259, %263 : vector<8x128xf32>
    %cst_27 = arith.constant 0.000000e+00 : f32
    %265 = vector.broadcast %cst_27 : f32 to vector<8x128xf32>
    %266 = arith.maximumf %264, %265 : vector<8x128xf32>
    %267 = arith.truncf %266 : vector<8x128xf32> to vector<8x128xbf16>
    %c0_28 = arith.constant 0 : index
    %c1536 = arith.constant 1536 : index
    %268 = vector.load %arg5[%c0_28, %c1536] : memref<8x2048xbf16, #tpu.memory_space<vmem>>, vector<8x128xbf16>
    tpu.vector_store %arg5[%c0_28, %c1536], %267 {strides = array<i32>} : memref<8x2048xbf16, #tpu.memory_space<vmem>>, vector<8x128xbf16>,
    %269 = vector.extract_strided_slice %0 {offsets = [0, 7], sizes = [8, 1], strides = [1, 1]} : vector<8x48xf32> to vector<8x1xf32>
    %270 = vector.extract_strided_slice %1 {offsets = [15, 0], sizes = [1, 128], strides = [1, 1]} : vector<24x128xf32> to vector<1x128xf32>
    %271 = vector.broadcast %269 : vector<8x1xf32> to vector<8x128xf32>
    %272 = vector.broadcast %270 : vector<1x128xf32> to vector<8x128xf32>
    %273 = arith.mulf %271, %272 : vector<8x128xf32>
    %274 = vector.extract_strided_slice %1 {offsets = [18, 0], sizes = [1, 128], strides = [1, 1]} : vector<24x128xf32> to vector<1x128xf32>
    %275 = vector.broadcast %274 : vector<1x128xf32> to vector<8x128xf32>
    %276 = arith.addf %273, %275 : vector<8x128xf32>
    %cst_29 = arith.constant 0.000000e+00 : f32
    %277 = vector.broadcast %cst_29 : f32 to vector<8x128xf32>
    %278 = arith.maximumf %276, %277 : vector<8x128xf32>
    %279 = arith.truncf %278 : vector<8x128xf32> to vector<8x128xbf16>
    %c0_30 = arith.constant 0 : index
    %c1664 = arith.constant 1664 : index
    %280 = vector.load %arg5[%c0_30, %c1664] : memref<8x2048xbf16, #tpu.memory_space<vmem>>, vector<8x128xbf16>
    tpu.vector_store %arg5[%c0_30, %c1664], %279 {strides = array<i32>} : memref<8x2048xbf16, #tpu.memory_space<vmem>>, vector<8x128xbf16>,
    %281 = vector.extract_strided_slice %0 {offsets = [0, 15], sizes = [8, 1], strides = [1, 1]} : vector<8x48xf32> to vector<8x1xf32>
    %282 = vector.extract_strided_slice %1 {offsets = [16, 0], sizes = [1, 128], strides = [1, 1]} : vector<24x128xf32> to vector<1x128xf32>
    %283 = vector.broadcast %281 : vector<8x1xf32> to vector<8x128xf32>
    %284 = vector.broadcast %282 : vector<1x128xf32> to vector<8x128xf32>
    %285 = arith.mulf %283, %284 : vector<8x128xf32>
    %286 = vector.extract_strided_slice %1 {offsets = [19, 0], sizes = [1, 128], strides = [1, 1]} : vector<24x128xf32> to vector<1x128xf32>
    %287 = vector.broadcast %286 : vector<1x128xf32> to vector<8x128xf32>
    %288 = arith.addf %285, %287 : vector<8x128xf32>
    %cst_31 = arith.constant 0.000000e+00 : f32
    %289 = vector.broadcast %cst_31 : f32 to vector<8x128xf32>
    %290 = arith.maximumf %288, %289 : vector<8x128xf32>
    %291 = arith.truncf %290 : vector<8x128xf32> to vector<8x128xbf16>
    %c0_32 = arith.constant 0 : index
    %c1792 = arith.constant 1792 : index
    %292 = vector.load %arg5[%c0_32, %c1792] : memref<8x2048xbf16, #tpu.memory_space<vmem>>, vector<8x128xbf16>
    tpu.vector_store %arg5[%c0_32, %c1792], %291 {strides = array<i32>} : memref<8x2048xbf16, #tpu.memory_space<vmem>>, vector<8x128xbf16>,
    %293 = vector.extract_strided_slice %0 {offsets = [0, 47], sizes = [8, 1], strides = [1, 1]} : vector<8x48xf32> to vector<8x1xf32>
    %294 = vector.extract_strided_slice %1 {offsets = [17, 0], sizes = [1, 128], strides = [1, 1]} : vector<24x128xf32> to vector<1x128xf32>
    %295 = vector.broadcast %293 : vector<8x1xf32> to vector<8x128xf32>
    %296 = vector.broadcast %294 : vector<1x128xf32> to vector<8x128xf32>
    %297 = arith.mulf %295, %296 : vector<8x128xf32>
    %298 = vector.extract_strided_slice %1 {offsets = [20, 0], sizes = [1, 128], strides = [1, 1]} : vector<24x128xf32> to vector<1x128xf32>
    %299 = vector.broadcast %298 : vector<1x128xf32> to vector<8x128xf32>
    %300 = arith.addf %297, %299 : vector<8x128xf32>
    %cst_33 = arith.constant 0.000000e+00 : f32
    %301 = vector.broadcast %cst_33 : f32 to vector<8x128xf32>
    %302 = arith.maximumf %300, %301 : vector<8x128xf32>
    %303 = arith.truncf %302 : vector<8x128xf32> to vector<8x128xbf16>
    %c0_34 = arith.constant 0 : index
    %c1920 = arith.constant 1920 : index
    %304 = vector.load %arg5[%c0_34, %c1920] : memref<8x2048xbf16, #tpu.memory_space<vmem>>, vector<8x128xbf16>
    tpu.vector_store %arg5[%c0_34, %c1920], %303 {strides = array<i32>} : memref<8x2048xbf16, #tpu.memory_space<vmem>>, vector<8x128xbf16>,
    %c0_35 = arith.constant 0 : index
    %c0_36 = arith.constant 0 : index
    %305 = vector.load %arg5[%c0_35, %c0_36] : memref<8x2048xbf16, #tpu.memory_space<vmem>>, vector<8x2048xbf16>
    %c0_37 = arith.constant 0 : index
    %c0_38 = arith.constant 0 : index
    %306 = vector.load %arg3[%c0_37, %c0_38] : memref<2048x128xbf16, #tpu.memory_space<vmem>>, vector<2048x128xbf16>
    %cst_39 = arith.constant dense<0.000000e+00> : vector<8x128xf32>
    %307 = tpu.matmul %305, %306, %cst_39 {dimension_numbers = #tpu.dot_dimension_numbers<[1], [0], [0], [1], [0, 0, 1, 1], [], []>} : vector<8x2048xbf16>, vector<2048x128xbf16>, vector<8x128xf32> -> vector<8x128xf32>
    %308 = vector.extract_strided_slice %1 {offsets = [21, 0], sizes = [1, 128], strides = [1, 1]} : vector<24x128xf32> to vector<1x128xf32>
    %309 = vector.broadcast %308 : vector<1x128xf32> to vector<8x128xf32>
    %310 = arith.addf %307, %309 : vector<8x128xf32>
    %cst_40 = arith.constant 0.000000e+00 : f32
    %311 = vector.broadcast %cst_40 : f32 to vector<8x128xf32>
    %312 = arith.maximumf %310, %311 : vector<8x128xf32>
    %313 = vector.extract_strided_slice %1 {offsets = [22, 0], sizes = [1, 128], strides = [1, 1]} : vector<24x128xf32> to vector<1x128xf32>
    %314 = vector.broadcast %313 : vector<1x128xf32> to vector<8x128xf32>
    %315 = arith.mulf %312, %314 : vector<8x128xf32>
    %cst_41 = arith.constant dense<0.000000e+00> : vector<8xf32>
    %316 = vector.multi_reduction <add>, %315, %cst_41 [1] : vector<8x128xf32> to vector<8xf32>
    %317 = vector.shape_cast %316 : vector<8xf32> to vector<8x1xf32>
    %318 = vector.extract_strided_slice %1 {offsets = [23, 0], sizes = [1, 1], strides = [1, 1]} : vector<24x128xf32> to vector<1x1xf32>
    %319 = vector.broadcast %318 : vector<1x1xf32> to vector<8x1xf32>
    %320 = arith.addf %317, %319 : vector<8x1xf32>
    %c0_42 = arith.constant 0 : index
    %c0_43 = arith.constant 0 : index
    %321 = vector.load %arg4[%c0_42, %c0_43] : memref<8x1xf32, #tpu.memory_space<vmem>>, vector<8x1xf32>
    tpu.vector_store %arg4[%c0_42, %c0_43], %320 {strides = array<i32>} : memref<8x1xf32, #tpu.memory_space<vmem>>, vector<8x1xf32>,
    return
  }
  func.func @transform_0(%arg0: i32) -> (i32, i32) {
    %c0_i32 = arith.constant 0 : i32
    %c0_i32_0 = arith.constant 0 : i32
    return %arg0, %c0_i32 : i32, i32
  }
  func.func @transform_1(%arg0: i32) -> (i32, i32) {
    %c0_i32 = arith.constant 0 : i32
    %c0_i32_0 = arith.constant 0 : i32
    %c0_i32_1 = arith.constant 0 : i32
    return %c0_i32, %c0_i32_0 : i32, i32
  }
  func.func @transform_2(%arg0: i32) -> (i32, i32) {
    %c0_i32 = arith.constant 0 : i32
    %c0_i32_0 = arith.constant 0 : i32
    %c0_i32_1 = arith.constant 0 : i32
    return %c0_i32, %c0_i32_0 : i32, i32
  }
  func.func @transform_3(%arg0: i32) -> (i32, i32) {
    %c0_i32 = arith.constant 0 : i32
    %c0_i32_0 = arith.constant 0 : i32
    return %arg0, %c0_i32 : i32, i32
  }
}

</mosaic_0001>

<bundles_post_ra>
// kernel: critic_forward.1
= control target key start
LH: loop header
LB: loop body
LE: loop exit
PB: predicated region body
PF: predicated region fallthrough
CT: control target
= control target key end

     0   :  { %8 = vsyncpa [#allocation4], 0  ;;  %s2350_s12 = smov [#allocation3]   ;;  %s2618_s0 = inlined_call_operand.vmem [shape: f32[8,48], index: 0, kind: input, shape index: {}]   ;;  %s2619_s1 = inlined_call_operand.vmem [shape: f32[24,128], index: 1, kind: input, shape index: {}]   ;;  %s2620_s2 = inlined_call_operand.hbm [shape: bf16[2048,128], index: 2, kind: input, shape index: {}]   ;;  %s2621_s3 = inlined_call_operand.vmem [shape: f32[8,1], index: 3, kind: output, shape index: {}]  }
   0x1   :  { %s18_s13 = sshll.u32 %s2350_s12, 4  ;;  %s2326_s16 = scalar_lea.hbm %s2620_s2, 16384  ;;  %s19_s13 = int_to_ptr.vmem [resolvable:$true] %s18_s13 }
   0x2   :  { %p2327_p0 = scmp.ne.s32.totalorder %s2620_s2, %s2326_s16  ;;  %p2330_p1 = scmp.lt.u32.totalorder %s2326_s16, %s2620_s2 }
   0x4   :  { %p2332_p2 = pnand %p2330_p1, %p2327_p0 }
   0x6   :  { %2335 = shalt.err (!%p2332_p2)
}
   0x7   :  { %s2336_s21 = scalar_lea.vmem %s19_s13, 16384  ;;  %p2341_p4 = scmp.lt.s32.totalorder %s19_s13, %s19_s13 }
   0x8   :  { %p2337_p3 = scmp.ne.s32.totalorder %s19_s13, %s2336_s21  ;;  %p2342_p5 = scmp.lt.s32.totalorder %s2336_s21, %s2336_s21 }
   0xa   :  { %p2343_p6 = por %p2342_p5, %p2341_p4 }
   0xc   :  { %p2344_p7 = pnand %p2343_p6, %p2337_p3 }
   0xe   :  { %2347 = shalt.err (!%p2344_p7)
}
   0xf   :  { %s2351_s22 = smov 64   ;;  %s2352_s23 = smov 4  }
  0x10   :  { %24 = dma.hbm_to_vmem [thread:$0]  %s2620_s2, 16384, %s19_s13, [#allocation4], %s2351_s22, %s2351_s22, %s2352_s23  }
  0x11   :  { %2348 = dma.done.wait [#allocation4], 16384  }
  0x12   :  { %2349 = vsyncadd [#allocation4], 4294950912  ;;  %v2353_v0 = vmov 18   ;;  %v2354_v1 = vmov 16   ;;  %v2413_v2 = vld [vmem:[%s2618_s0] sm:$0xff]  ;;  %v2184_v5 = vld [vmem:[#allocation3 + $0x48] sm:$0xff]   ;;  %v33_v60 = vlaneseq }
  0x13   :  { %2158 = vset.pattern.permute.xlu1 %v2353_v0  ;;  %2156 = vset.pattern.permute.xlu0 %v2354_v1  ;;  %v2182_v3 = vld [vmem:[#allocation3 + $0x40] sm:$0xff]   ;;  %v2355_v6 = vmov 19   ;;  %v2356_v7 = vmov 17   ;;  %v2186_v9 = vld [vmem:[#allocation3 + $0x8] sm:$0xff]   ;;  %v2188_v11 = vld [vmem:[#allocation3 + $0x50] sm:$0xff]   ;;  %v2357_v13 = vmov 20  }
  0x14   :  { %67 = vperm.xlu1 %2158, %v2413_v2   ;;  %55 = vperm.xlu0 %2156, %v2413_v2   ;;  %v2183_v4 = vld [vmem:[#allocation3] sm:$0xff]   ;;  %v2189_v12 = vld [vmem:[#allocation3 + $0xc8] sm:$0xff]   ;;  %v2358_v14 = vmov 21   ;;  %v2190_v15 = vld [vmem:[#allocation3 + $0x10] sm:$0xff]   ;;  %v2359_v20 = vmov 22   ;;  %v2360_v21 = vmov 25  }
  0x15   :  { %1952 = vmatprep.subr.bf16.mxu0 %v2182_v3  ;;  %v2185_v8 = vld [vmem:[#allocation3 + $0xc0] sm:$0xff]   ;;  %v2191_v16 = vld [vmem:[#allocation3 + $0x88] sm:$0xff]   ;;  %v2192_v17 = vld [vmem:[#allocation3 + $0x58] sm:$0xff]   ;;  %v2361_v27 = vmov 24   ;;  %v2362_v28 = vmov 23   ;;  %v2363_v34 = vmov 26  }
  0x16   :  { %1953 = vmatpush3.bf16.msra.mxu0 %v2183_v4  ;;  %1974 = vmatprep.subr.bf16.mxu1 %v2185_v8  ;;  %v2187_v10 = vld [vmem:[#allocation3 + $0x80] sm:$0xff]   ;;  %v2193_v18 = vld [vmem:[#allocation3 + $0xd0] sm:$0xff]   ;;  %v2194_v19 = vld [vmem:[#allocation3 + $0x18] sm:$0xff]   ;;  %v2364_v35 = vmov 32   ;;  %v2365_v41 = vmov 27   ;;  %v2366_v42 = vmov 34  }
  0x17   :  { %1954 = vmatprep.subr.bf16.mxu0 %v2184_v5  ;;  %1975 = vmatpush3.bf16.msra.mxu1 %v2187_v10  ;;  %v2195_v22 = vld [vmem:[#allocation3 + $0x90] sm:$0xff]   ;;  %v2196_v23 = vld [vmem:[#allocation3 + $0x60] sm:$0xff]   ;;  %v2197_v24 = vld [vmem:[#allocation3 + $0xd8] sm:$0xff]   ;;  %v2367_v47 = vmov 28   ;;  %v2368_v48 = vmov 36   ;;  %v2369_v51 = vmov 29  }
  0x18   :  { %2159 = vset.pattern.permute.xlu1 %v2355_v6  ;;  %2157 = vset.pattern.permute.xlu0 %v2356_v7  ;;  %v2198_v25 = vld [vmem:[#allocation3 + $0x20] sm:$0xff]   ;;  %v2199_v26 = vld [vmem:[#allocation3 + $0x98] sm:$0xff]   ;;  %v2200_v29 = vld [vmem:[#allocation3 + $0x68] sm:$0xff]   ;;  %v2370_v52 = vmov 15   ;;  %v2371_v53 = vmov 33   ;;  %v2372_v54 = vmov 47  }
  0x19   :  { %73 = vperm.xlu1 %2159, %v2413_v2   ;;  %61 = vperm.xlu0 %2157, %v2413_v2   ;;  %v2201_v30 = vld [vmem:[#allocation3 + $0xe0] sm:$0xff]   ;;  %v2202_v31 = vld [vmem:[#allocation3 + $0x28] sm:$0xff]   ;;  %v2204_v33 = vld [vmem:[#allocation3 + $0x70] sm:$0xff]   ;;  %v2373_v55 = vmov 30   ;;  %v2374_v56 = vmov 31   ;;  %v2375_v57 = vmov 35  }
  0x1a   :  { %1955 = vmatpush3.bf16.msra.mxu0 %v2186_v9  ;;  %1976 = vmatprep.subr.bf16.mxu1 %v2189_v12  ;;  %v2203_v32 = vld [vmem:[#allocation3 + $0xa0] sm:$0xff]   ;;  %v2205_v36 = vld [vmem:[#allocation3 + $0xe8] sm:$0xff]   ;;  %v2206_v37 = vld [vmem:[#allocation3 + $0x30] sm:$0xff]   ;;  %v2376_v58 = vmov 37   ;;  %v2377_v59 = vmov 7   ;;  %v2440_v61 = vshrl.u32 %v33_v60, 7 }
  0x1b   :  { %1956 = vmatprep.subr.bf16.mxu0 %v2188_v11  ;;  %1977 = vmatpush3.bf16.msra.mxu1 %v2191_v16  ;;  %v2207_v38 = vld [vmem:[#allocation3 + $0xa8] sm:$0xff]   ;;  %v2208_v39 = vld [vmem:[#allocation3 + $0x78] sm:$0xff]   ;;  %v2209_v40 = vld [vmem:[#allocation3 + $0xf0] sm:$0xff]   ;;  %vm1801_vm0 = vcmask 7168  }
  0x1c   :  { %1978 = vmatprep.subr.bf16.mxu1 %v2193_v18  ;;  %v2210_v43 = vld [vmem:[#allocation3 + $0x38] sm:$0xff]   ;;  %v2211_v44 = vld [vmem:[#allocation3 + $0xb0] sm:$0xff]   ;;  %v2213_v46 = vld [vmem:[#allocation3 + $0x140] sm:$0xff]   ;;  %v2443_v62 = vsub.s32 0, %v2440_v61  ;;  %v2451_v0 = vsub.s32 4, %v2440_v61  ;;  %v2461_v3 = vsub.s32 1, %v2440_v61 }
  0x1d   :  { %2160 = vset.pattern.permute.xlu1 %v2357_v13  ;;  %2161 = vset.pattern.permute.xlu0 %v2358_v14  ;;  %v2212_v45 = vld [vmem:[#allocation3 + $0xf8] sm:$0xff]   ;;  %v2221_v50 = vld [vmem:[#allocation3 + $0x1c0] sm:$0xff]   ;;  %v2464_v6 = vsub.s32 2, %v2440_v61  ;;  %v2467_v8 = vsub.s32 3, %v2440_v61 }
  0x1e   :  { %88 = vperm.xlu1 %2160, %v2413_v2   ;;  %103 = vperm.xlu0 %2161, %v2413_v2   ;;  %v2216_v49 = vld [vmem:[#allocation3 + $0xb8] sm:$0xff]   ;;  %v2448_v63 = vld [vmem:[%s2619_s1] sm:$0xff] }
  0x1f   :  { %1957 = vmatpush3.bf16.msra.mxu0 %v2190_v15  ;;  %1979 = vmatpush3.bf16.msra.mxu1 %v2195_v22  ;;  %v40_v1 = vrot.slane %v2448_v63, %v2443_v62  ;;  %v44_v10 = vrot.slane %v2448_v63, %v2461_v3  ;;  %v48_v12 = vrot.slane %v2448_v63, %v2464_v6  ;;  %v2478_v22 = vsub.s32 5, %v2440_v61 }
  0x20   :  { %1958 = vmatprep.subr.bf16.mxu0 %v2192_v17  ;;  %1980 = vmatprep.subr.bf16.mxu1 %v2197_v24  ;;  %v52_v16 = vrot.slane %v2448_v63, %v2467_v8 }
  0x22   :  { %2162 = vset.pattern.permute.xlu1 %v2359_v20  ;;  %2164 = vset.pattern.permute.xlu0 %v2360_v21 }
  0x23   :  { %118 = vperm.xlu1 %2162, %v2413_v2   ;;  %168 = vperm.xlu0 %2164, %v2413_v2  }
  0x24   :  { %1959 = vmatpush3.bf16.msra.mxu0 %v2194_v19  ;;  %1981 = vmatpush3.bf16.msra.mxu1 %v2199_v26 }
  0x25   :  { %1960 = vmatprep.subr.bf16.mxu0 %v2196_v23  ;;  %1982 = vmatprep.subr.bf16.mxu1 %v2201_v30 }
  0x27   :  { %2163 = vset.pattern.permute.xlu1 %v2361_v27  ;;  %2167 = vset.pattern.permute.xlu0 %v2362_v28 }
  0x28   :  { %162 = vperm.xlu1 %2163, %v2413_v2   ;;  %133 = vperm.xlu0 %2167, %v2413_v2  }
  0x29   :  { %1961 = vmatpush3.bf16.msra.mxu0 %v2198_v25  ;;  %1983 = vmatpush3.bf16.msra.mxu1 %v2203_v32 }
  0x2a   :  { %1962 = vmatprep.subr.bf16.mxu0 %v2200_v29  ;;  %1984 = vmatprep.subr.bf16.mxu1 %v2205_v36 }
  0x2c   :  { %2165 = vset.pattern.permute.xlu1 %v2363_v34  ;;  %2170 = vset.pattern.permute.xlu0 %v2364_v35 }
  0x2d   :  { %174 = vperm.xlu1 %2165, %v2413_v2   ;;  %269 = vperm.xlu0 %2170, %v2413_v2  }
  0x2e   :  { %1963 = vmatpush3.bf16.msra.mxu0 %v2202_v31  ;;  %1985 = vmatpush3.bf16.msra.mxu1 %v2207_v38 }
  0x2f   :  { %1964 = vmatprep.subr.bf16.mxu0 %v2204_v33  ;;  %1986 = vmatprep.subr.bf16.mxu1 %v2209_v40 }
  0x31   :  { %2166 = vset.pattern.permute.xlu1 %v2365_v41  ;;  %2173 = vset.pattern.permute.xlu0 %v2366_v42 }
  0x32   :  { %180 = vperm.xlu1 %2166, %v2413_v2   ;;  %281 = vperm.xlu0 %2173, %v2413_v2  }
  0x33   :  { %1965 = vmatpush3.bf16.msra.mxu0 %v2206_v37  ;;  %1987 = vmatpush3.bf16.msra.mxu1 %v2211_v44 }
  0x34   :  { %1966 = vmatprep.subr.bf16.mxu0 %v2208_v39  ;;  %1988 = vmatprep.subr.bf16.mxu1 %v2212_v45 }
  0x36   :  { %2168 = vset.pattern.permute.xlu1 %v2367_v47  ;;  %2176 = vset.pattern.permute.xlu0 %v2368_v48 }
  0x37   :  { %195 = vperm.xlu1 %2168, %v2413_v2   ;;  %302 = vperm.xlu0 %2176, %v2413_v2  }
  0x38   :  { %1967 = vmatpush3.bf16.msra.mxu0 %v2210_v43  ;;  %1989 = vmatpush3.bf16.msra.mxu1 %v2216_v49 }
  0x39   :  { %1996 = vmatprep.subr.bf16.mxu0 %v2213_v46  ;;  %2018 = vmatprep.subr.bf16.mxu1 %v2221_v50 }
  0x3b   :  { %2169 = vset.pattern.permute.xlu1 %v2369_v51  ;;  %2179 = vset.pattern.permute.xlu0 %v2370_v52  ;;  %v2482_v51 = vrot.slane %v2448_v63, %v2451_v0 }
  0x3c   :  { %210 = vperm.xlu1 %2169, %v2413_v2   ;;  %343 = vperm.xlu0 %2179, %v2413_v2  }
  0x40   :  { %2171 = vset.pattern.permute.xlu1 %v2371_v53  ;;  %2181 = vset.pattern.permute.xlu0 %v2372_v54 }
  0x41   :  { %275 = vperm.xlu1 %2171, %v2413_v2  }
  0x45   :  { %2172 = vset.pattern.permute.xlu1 %v2373_v55 }
  0x46   :  { %225 = vperm.xlu1 %2172, %v2413_v2  }
  0x4a   :  { %2174 = vset.pattern.permute.xlu1 %v2374_v56  ;;  %v2486_v56 = vrot.slane %v2448_v63, %v2478_v22 }
  0x4b   :  { %240 = vperm.xlu1 %2174, %v2413_v2  }
  0x4f   :  { %2175 = vset.pattern.permute.xlu1 %v2375_v57 }
  0x50   :  { %287 = vperm.xlu1 %2175, %v2413_v2  }
  0x54   :  { %2177 = vset.pattern.permute.xlu1 %v2376_v58 }
  0x55   :  { %317 = vperm.xlu1 %2177, %v2413_v2  }
  0x59   :  { %2178 = vset.pattern.permute.xlu1 %v2377_v59 }
  0x5a   :  { %326 = vperm.xlu1 %2178, %v2413_v2  }
  0x5e   :  { %2180 = vset.pattern.permute.xlu1 %v2372_v54 }
  0x5f   :  { %360 = vperm.xlu1 %2180, %v2413_v2   ;;  %v2458_v2 = vld [vmem:[%s2619_s1 + $0x8] sm:$0xff] }
  0x60   :  { %v36_v9 = vrot.slane %v2458_v2, %v2451_v0 }
  0x93   :  { %v68_v4 = vpop.permute.xlu1 %67  ;;  %v56_v5 = vpop.permute.xlu0 %55 }
  0x94   :  { %v58_v7 = vmul.f32 %v56_v5, %v40_v1  ;;  %v96_v11 = vmul.f32 %v68_v4, %v40_v1  ;;  %v70_v23 = vmul.f32 %v68_v4, %v48_v12  ;;  %v83_v24 = vmul.f32 %v68_v4, %v44_v10 }
  0x95   :  { %v2489_v4 = vsub.s32 6, %v2440_v61 }
  0x96   :  { %v59_v13 = vadd.f32 %v58_v7, %v36_v9  ;;  %v97_v21 = vadd.f32 %v96_v11, %v36_v9 }
  0x98   :  { %v74_v14 = vpop.permute.xlu1 %73  ;;  %v62_v15 = vpop.permute.xlu0 %61 }
  0x99   :  { %v98_v17 = vmul.f32 %v74_v14, %v44_v10  ;;  %v111_v18 = vmul.f32 %v74_v14, %v40_v1  ;;  %v64_v19 = vmul.f32 %v62_v15, %v44_v10  ;;  %v81_v20 = vmul.f32 %v62_v15, %v40_v1 }
  0x9a   :  { %v76_v27 = vmul.f32 %v74_v14, %v52_v16  ;;  %v85_v28 = vmul.f32 %v74_v14, %v48_v12 }
  0x9b   :  { %v65_v25 = vadd.f32 %v64_v19, %v59_v13  ;;  %v82_v26 = vadd.f32 %v81_v20, %v36_v9  ;;  %v99_v29 = vadd.f32 %v98_v17, %v97_v21  ;;  %v112_v30 = vadd.f32 %v111_v18, %v36_v9 }
  0x9c   :  { %v2500_v20 = vrot.slane %v2448_v63, %v2489_v4 }
  0x9d   :  { %v89_v31 = vpop.permute.xlu1 %88  ;;  %v104_v32 = vpop.permute.xlu0 %103  ;;  %v71_v33 = vadd.f32 %v70_v23, %v65_v25  ;;  %v84_v34 = vadd.f32 %v83_v24, %v82_v26  ;;  %v2504_v24 = vsub.s32 7, %v2440_v61 }
  0x9e   :  { %v91_v35 = vmul.f32 %v89_v31, %v52_v16  ;;  %v100_v36 = vmul.f32 %v89_v31, %v48_v12  ;;  %v113_v37 = vmul.f32 %v89_v31, %v44_v10  ;;  %v126_v38 = vmul.f32 %v89_v31, %v40_v1 }
  0x9f   :  { %v106_v39 = vmul.f32 %v104_v32, %v52_v16  ;;  %v115_v40 = vmul.f32 %v104_v32, %v48_v12  ;;  %v77_v41 = vadd.f32 %v76_v27, %v71_v33  ;;  %v86_v42 = vadd.f32 %v85_v28, %v84_v34 }
  0xa0   :  { %v101_v43 = vadd.f32 %v100_v36, %v99_v29  ;;  %v128_v44 = vmul.f32 %v104_v32, %v44_v10  ;;  %v114_v45 = vadd.f32 %v113_v37, %v112_v30  ;;  %v127_v46 = vadd.f32 %v126_v38, %v36_v9  ;;  %v2217_v37 = vld [vmem:[#allocation3 + $0x100] sm:$0xff]  }
  0xa1   :  { %v78_v47 = vmax.f32 %v77_v41, 0.0  ;;  %v92_v48 = vadd.f32 %v91_v35, %v86_v42  ;;  %v2493_v9 = vrot.slane %v2458_v2, %v2478_v22  ;;  %v2513_v32 = vrot.slane %v2448_v63, %v2504_v24 }
  0xa2   :  { %v107_v49 = vadd.f32 %v106_v39, %v101_v43  ;;  %v119_v50 = vpop.permute.xlu1 %118  ;;  %v169_v52 = vpop.permute.xlu0 %168  ;;  %v116_v53 = vadd.f32 %v115_v40, %v114_v45  ;;  %v129_v54 = vadd.f32 %v128_v44, %v127_v46  ;;  %v2220_v40 = vld [vmem:[#allocation3 + $0x148] sm:$0xff]   ;;  %v2223_v46 = vld [vmem:[#allocation3 + $0x180] sm:$0xff]  }
  0xa3   :  { %v121_v55 = vmul.f32 %v119_v50, %v52_v16  ;;  %v79_v57 = vpack.c.bf16 %v78_v47, %v78_v47  ;;  %v93_v58 = vmax.f32 %v92_v48, 0.0  ;;  %v130_v60 = vmul.f32 %v119_v50, %v48_v12  ;;  %v2222_v50 = vld [vmem:[#allocation3 + $0x108] sm:$0xff]  }
  0xa4   :  { %v108_v59 = vmax.f32 %v107_v49, 0.0  ;;  %v171_v15 = vmul.f32 %v169_v52, %v2486_v56  ;;  %v188_v19 = vmul.f32 %v169_v52, %v2482_v51  ;;  %v2225_v52 = vld [vmem:[#allocation3 + $0x1c8] sm:$0xff]  }
  0xa5   :  { %v122_v1 = vadd.f32 %v121_v55, %v116_v53  ;;  %80 = vst [vmem:[#allocation2] sm:$0xf] %v79_v57  ;;  %v94_v5 = vpack.c.bf16 %v93_v58, %v93_v58  ;;  %v131_v14 = vadd.f32 %v130_v60, %v129_v54  ;;  %v2224_v54 = vld [vmem:[#allocation3 + $0x150] sm:$0xff]  }
  0xa6   :  { %v109_v7 = vpack.c.bf16 %v108_v59, %v108_v59  ;;  %v189_v28 = vadd.f32 %v188_v19, %v2493_v9  ;;  %v2227_v59 = vld [vmem:[#allocation3 + $0x188] sm:$0xff]  }
  0xa7   :  { %v123_v10 = vmax.f32 %v122_v1, 0.0  ;;  %v134_v11 = vpop.permute.xlu0 %133  ;;  %v163_v13 = vpop.permute.xlu1 %162  ;;  %95 = vst [vmem:[#allocation2 + $0x4] sm:$0xf] %v94_v5 }
  0xa8   :  { %110 = vst [vmem:[#allocation2 + $0x8] sm:$0xf] %v109_v7  ;;  %v136_v12 = vmul.f32 %v134_v11, %v52_v16  ;;  %v165_v17 = vmul.f32 %v163_v13, %v2482_v51  ;;  %v2229_v11 = vld [vmem:[#allocation3 + $0x1d0] sm:$0xff]  }
  0xa9   :  { %v124_v18 = vpack.c.bf16 %v123_v10, %v123_v10  ;;  %v2226_v10 = vld [vmem:[#allocation3 + $0x110] sm:$0xff]  }
  0xaa   :  { %v137_v21 = vadd.f32 %v136_v12, %v131_v14  ;;  %v166_v23 = vadd.f32 %v165_v17, %v2493_v9  ;;  %v2529_v13 = vld [vmem:[%s2619_s1 + $0x10] sm:$0xff] }
  0xab   :  { %125 = vst [vmem:[#allocation2 + $0xc] sm:$0xf] %v124_v18  ;;  %v349_v12 = vrot.slane %v2529_v13, %v2443_v62 }
  0xac   :  { %v138_v25 = vmax.f32 %v137_v21, 0.0  ;;  %v172_v26 = vadd.f32 %v171_v15, %v166_v23  ;;  %v175_v27 = vpop.permute.xlu1 %174  ;;  %v2506_v16 = vpop.permute.xlu0 %269  ;;  %v2228_v15 = vld [vmem:[#allocation3 + $0x158] sm:$0xff]   ;;  %v2231_v21 = vld [vmem:[#allocation3 + $0x190] sm:$0xff]   ;;  %v354_v23 = vrot.slane %v2529_v13, %v2467_v8 }
  0xad   :  { %v177_v29 = vmul.f32 %v175_v27, %v2500_v20  ;;  %v190_v30 = vmul.f32 %v175_v27, %v2486_v56  ;;  %v203_v34 = vmul.f32 %v175_v27, %v2482_v51 }
  0xae   :  { %v139_v31 = vpack.c.bf16 %v138_v25, %v138_v25  ;;  %v376_v33 = vld [vmem:[#allocation2] sm:$0xff] }
  0xaf   :  { %v178_v61 = vadd.f32 %v177_v29, %v172_v26  ;;  %v1808_v35 = vcombine.low %v376_v33, %v376_v33  ;;  %v1809_v36 = vcombine.high %v376_v33, %v376_v33  ;;  %v191_v38 = vadd.f32 %v190_v30, %v189_v28  ;;  %v2230_v28 = vld [vmem:[#allocation3 + $0x118] sm:$0xff]   ;;  %v2232_v33 = vld [vmem:[#allocation3 + $0x160] sm:$0xff]  }
  0xb0   :  { %140 = vst [vmem:[#allocation2 + $0x10] sm:$0xf] %v139_v31  ;;  %v204_v47 = vadd.f32 %v203_v34, %v2493_v9  ;;  %v2233_v29 = vld [vmem:[#allocation3 + $0x1d8] sm:$0xff]   ;;  %v2539_v31 = vrot.slane %v2458_v2, %v2443_v62  ;;  %v2234_v62 = vld [vmem:[#allocation3 + $0x120] sm:$0xff]  }
  0xb1   :  { %v181_v39 = vpop.permute.xlu1 %180  ;;  %v2516_v41 = vpop.permute.xlu0 %281  ;;  %1500 = vmatprep.mubr.bf16.mxu0 %v1809_v36 }
  0xb2   :  { %v183_v42 = vmul.f32 %v181_v39, %v2513_v32  ;;  %v192_v43 = vmul.f32 %v181_v39, %v2500_v20  ;;  %v377_v63 = vld [vmem:[#allocation2 + $0x8] sm:$0xff]  ;;  %1501 = vmatmul.mubr.bf16.vlgmr.msra.gmra.mrb[0].mxu0 %v1808_v35  ;;  %v205_v49 = vmul.f32 %v181_v39, %v2486_v56  ;;  %v218_v17 = vmul.f32 %v181_v39, %v2482_v51 }
  0xb3   :  { %v1810_v44 = vcombine.low %v377_v63, %v377_v63  ;;  %v1811_v45 = vcombine.high %v377_v63, %v377_v63  ;;  %1997 = vmatpush3.bf16.msra.mxu0 %v2217_v37  ;;  %v2235_v37 = vld [vmem:[#allocation3 + $0x198] sm:$0xff]   ;;  %v2550_v63 = vrot.slane %v2458_v2, %v2461_v3 }
  0xb4   :  { %v184_v48 = vadd.f32 %v183_v42, %v178_v61  ;;  %v193_v53 = vadd.f32 %v192_v43, %v191_v38  ;;  %1998 = vmatprep.subr.bf16.mxu0 %v2220_v40  ;;  %v206_v5 = vadd.f32 %v205_v49, %v204_v47  ;;  %v219_v34 = vadd.f32 %v218_v17, %v2493_v9 }
  0xb5   :  { %1540 = vmatprep.mubr.bf16.mxu1 %v1811_v45  ;;  %v2545_v40 = vrot.slane %v2458_v2, %v2489_v4  ;;  %v2238_v45 = vld [vmem:[#allocation3 + $0x168] sm:$0xff]   ;;  %v272_v47 = vmul.f32 %v2506_v16, %v2539_v31 }
  0xb6   :  { %v185_v55 = vmax.f32 %v184_v48, 0.0  ;;  %1541 = vmatmul.mubr.bf16.vlgmr.msra.gmra.mrb[0].mxu1 %v1810_v44  ;;  %v196_v57 = vpop.permute.xlu1 %195  ;;  %v2523_v60 = vpop.permute.xlu0 %302 }
  0xb7   :  { %2019 = vmatpush3.bf16.msra.mxu1 %v2223_v46  ;;  %v198_v58 = vmul.f32 %v196_v57, %v2513_v32  ;;  %1999 = vmatpush3.bf16.msra.mxu0 %v2222_v50  ;;  %v207_v7 = vmul.f32 %v196_v57, %v2500_v20  ;;  %v220_v35 = vmul.f32 %v196_v57, %v2486_v56  ;;  %v2239_v46 = vld [vmem:[#allocation3 + $0x1e0] sm:$0xff]  }
  0xb8   :  { %v186_v1 = vpack.c.bf16 %v185_v55, %v185_v55  ;;  %2020 = vmatprep.subr.bf16.mxu1 %v2225_v52  ;;  %2000 = vmatprep.subr.bf16.mxu0 %v2224_v54  ;;  %v233_v43 = vmul.f32 %v196_v57, %v2482_v51  ;;  %v2240_v55 = vld [vmem:[#allocation3 + $0x128] sm:$0xff]  }
  0xb9   :  { %v199_v14 = vadd.f32 %v198_v58, %v193_v53  ;;  %v208_v26 = vadd.f32 %v207_v7, %v206_v5  ;;  %v221_v49 = vadd.f32 %v220_v35, %v219_v34  ;;  %v2241_v53 = vld [vmem:[#allocation3 + $0x1a0] sm:$0xff]   ;;  %v2243_v57 = vld [vmem:[#allocation3 + $0x1e8] sm:$0xff]   ;;  %v263_v58 = vrot.slane %v2458_v2, %v2464_v6  ;;  %v2242_v5 = vld [vmem:[#allocation3 + $0x170] sm:$0xff]  }
  0xba   :  { %187 = vst [vmem:[#allocation2 + $0x14] sm:$0xf] %v186_v1  ;;  %v234_v16 = vadd.f32 %v233_v43, %v2493_v9  ;;  %v273_v7 = vadd.f32 %v272_v47, %v2545_v40  ;;  %v2245_v9 = vld [vmem:[#allocation3 + $0x1a8] sm:$0xff]   ;;  %v267_v35 = vrot.slane %v2458_v2, %v2467_v8 }
  0xbb   :  { %v200_v18 = vmax.f32 %v199_v14, 0.0  ;;  %2021 = vmatpush3.bf16.msra.mxu1 %v2227_v59  ;;  %v211_v19 = vpop.permute.xlu1 %210  ;;  %v344_v25 = vpop.permute.xlu0 %343  ;;  %2001 = vmatpush3.bf16.msra.mxu0 %v2226_v10  ;;  %v314_v47 = vmul.f32 %v2523_v60, %v263_v58 }
  0xbc   :  { %v213_v27 = vmul.f32 %v211_v19, %v2513_v32  ;;  %2022 = vmatprep.subr.bf16.mxu1 %v2229_v11  ;;  %2002 = vmatprep.subr.bf16.mxu0 %v2228_v15  ;;  %v350_v61 = vmul.f32 %v349_v12, %v344_v25  ;;  %v222_v52 = vmul.f32 %v211_v19, %v2500_v20 }
  0xbd   :  { %v201_v30 = vpack.c.bf16 %v200_v18, %v200_v18  ;;  %v235_v59 = vmul.f32 %v211_v19, %v2486_v56  ;;  %v2244_v56 = vld [vmem:[#allocation3 + $0x130] sm:$0xff]   ;;  %v297_v25 = vmul.f32 %v2516_v41, %v2550_v63  ;;  %v305_v8 = vmul.f32 %v2523_v60, %v267_v35  ;;  %v2259_v60 = vld [vmem:[#allocation3 + $0x280] sm:$0xff]  }
  0xbe   :  { %v214_v36 = vadd.f32 %v213_v27, %v208_v26  ;;  %v355_v38 = vadd.f32 %v354_v23, %v350_v61  ;;  %v223_v10 = vadd.f32 %v222_v52, %v221_v49  ;;  %v2247_v18 = vld [vmem:[#allocation3 + $0x1f0] sm:$0xff]   ;;  %v284_v23 = vmul.f32 %v2516_v41, %v263_v58 }
  0xbf   :  { %202 = vst [vmem:[#allocation2 + $0x18] sm:$0xf] %v201_v30  ;;  %2023 = vmatpush3.bf16.msra.mxu1 %v2231_v21  ;;  %2003 = vmatpush3.bf16.msra.mxu0 %v2230_v28  ;;  %v236_v19 = vadd.f32 %v235_v59, %v234_v16  ;;  %v2246_v21 = vld [vmem:[#allocation3 + $0x178] sm:$0xff]   ;;  %v2249_v61 = vld [vmem:[#allocation3 + $0x1b0] sm:$0xff]  }
  0xc0   :  { %v215_v39 = vmax.f32 %v214_v36, 0.0  ;;  %v276_v42 = vpop.permute.xlu1 %275  ;;  %2024 = vmatprep.subr.bf16.mxu1 %v2233_v29  ;;  %2004 = vmatprep.subr.bf16.mxu0 %v2232_v33  ;;  %v356_v48 = vmax.f32 %v355_v38, 0.0  ;;  %v310_v29 = vmul.f32 %v2516_v41, %v2539_v31 }
  0xc1   :  { %v2552_v44 = vld [vmem:[#allocation2 + $0x10] sm:$0xff]  ;;  %v278_v11 = vmul.f32 %v276_v42, %v2550_v63  ;;  %v295_v14 = vmul.f32 %v276_v42, %v2539_v31 }
  0xc2   :  { %v216_v50 = vpack.c.bf16 %v215_v39, %v215_v39  ;;  %v1813_v51 = vcombine.high %v2552_v44, %v2552_v44  ;;  %v357_v54 = vpack.c.bf16 %v356_v48, %v356_v48  ;;  %v2252_v39 = vld [vmem:[#allocation3 + $0x1f8] sm:$0xff]   ;;  %v2255_v48 = vld [vmem:[#allocation3 + $0x200] sm:$0xff]  }
  0xc3   :  { %2025 = vmatpush3.bf16.msra.mxu1 %v2235_v37  ;;  %2005 = vmatpush3.bf16.msra.mxu0 %v2234_v62  ;;  %v296_v26 = vadd.f32 %v295_v14, %v2545_v40  ;;  %v2248_v37 = vld [vmem:[#allocation3 + $0x138] sm:$0xff]   ;;  %v2253_v62 = vld [vmem:[#allocation3 + $0x240] sm:$0xff]  }
  0xc4   :  { %217 = vst [vmem:[#allocation2 + $0x1c] sm:$0xf] %v216_v50  ;;  %1580 = vmatprep.mubr.bf16.mxu0 %v1813_v51  ;;  %2006 = vmatprep.subr.bf16.mxu0 %v2238_v45  ;;  %358 = vst [vmem:[#allocation2 + $0x38] sm:$0xf] %v357_v54  ;;  %v2254_v45 = vld [vmem:[#allocation3 + $0x1b8] sm:$0xff]   ;;  %v2257_v51 = vld [vmem:[#allocation3 + $0x2c0] sm:$0xff]  }
  0xc5   :  { %v226_v1 = vpop.permute.xlu1 %225  ;;  %2026 = vmatprep.subr.bf16.mxu1 %v2239_v46  ;;  %v298_v31 = vadd.f32 %v297_v25, %v296_v26  ;;  %v2256_v54 = vld [vmem:[#allocation3 + $0x248] sm:$0xff]  }
  0xc6   :  { %v228_v15 = vmul.f32 %v226_v1, %v2513_v32  ;;  %v237_v12 = vmul.f32 %v226_v1, %v2500_v20  ;;  %v279_v20 = vadd.f32 %v278_v11, %v273_v7  ;;  %v2261_v7 = vld [vmem:[#allocation3 + $0x2c8] sm:$0xff]  }
  0xc7   :  { %2027 = vmatpush3.bf16.msra.mxu1 %v2241_v53  ;;  %2007 = vmatpush3.bf16.msra.mxu0 %v2240_v55  ;;  %v1812_v53 = vcombine.low %v2552_v44, %v2552_v44  ;;  %v2260_v44 = vld [vmem:[#allocation3 + $0x250] sm:$0xff]  }
  0xc8   :  { %v229_v17 = vadd.f32 %v228_v15, %v223_v10  ;;  %2028 = vmatprep.subr.bf16.mxu1 %v2243_v57  ;;  %2008 = vmatprep.subr.bf16.mxu0 %v2242_v5  ;;  %v238_v30 = vadd.f32 %v237_v12, %v236_v19  ;;  %v285_v41 = vadd.f32 %v284_v23, %v279_v20  ;;  %v2258_v5 = vld [vmem:[#allocation3 + $0x208] sm:$0xff]   ;;  %v2267_v19 = vld [vmem:[#allocation3 + $0x2d0] sm:$0xff]   ;;  %v2264_v23 = vld [vmem:[#allocation3 + $0x258] sm:$0xff]  }
  0xc9   :  { %v332_v12 = vrot.slane %v2458_v2, %v2504_v24  ;;  %v2269_v20 = vld [vmem:[#allocation3 + $0x290] sm:$0xff]  }
  0xca   :  { %v230_v27 = vmax.f32 %v229_v17, 0.0  ;;  %v241_v28 = vpop.permute.xlu1 %240 }
  0xcb   :  { %v243_v33 = vmul.f32 %v241_v28, %v2513_v32  ;;  %2029 = vmatpush3.bf16.msra.mxu1 %v2245_v9  ;;  %v379_v34 = vld [vmem:[#allocation2 + $0x18] sm:$0xff]  ;;  %2009 = vmatpush3.bf16.msra.mxu0 %v2244_v56  ;;  %v311_v32 = vadd.f32 %v310_v29, %v2545_v40  ;;  %v2263_v9 = vld [vmem:[#allocation3 + $0x288] sm:$0xff]  }
  0xcc   :  { %v231_v36 = vpack.c.bf16 %v230_v27, %v230_v27  ;;  %2030 = vmatprep.subr.bf16.mxu1 %v2247_v18  ;;  %v1815_v38 = vcombine.high %v379_v34, %v379_v34  ;;  %2010 = vmatprep.subr.bf16.mxu0 %v2246_v21  ;;  %v1814_v59 = vcombine.low %v379_v34, %v379_v34  ;;  %v2262_v18 = vld [vmem:[#allocation3 + $0x210] sm:$0xff]   ;;  %v2270_v34 = vld [vmem:[#allocation3 + $0x260] sm:$0xff]  }
  0xcd   :  { %v244_v42 = vadd.f32 %v243_v33, %v238_v30  ;;  %v337_v21 = vrot.slane %v2529_v13, %v2464_v6  ;;  %v366_v30 = vrot.slane %v2529_v13, %v2461_v3  ;;  %v2268_v6 = vld [vmem:[#allocation3 + $0x218] sm:$0xff]   ;;  %v2272_v3 = vld [vmem:[#allocation3 + $0x220] sm:$0xff]  }
  0xce   :  { %232 = vst [vmem:[#allocation2 + $0x20] sm:$0xf] %v231_v36  ;;  %1620 = vmatprep.mubr.bf16.mxu1 %v1815_v38  ;;  %v2271_v33 = vld [vmem:[#allocation3 + $0x2d8] sm:$0xff]  }
  0xcf   :  { %v245_v43 = vmax.f32 %v244_v42, 0.0  ;;  %2031 = vmatpush3.bf16.msra.mxu1 %v2249_v61  ;;  %v288_v46 = vpop.permute.xlu1 %287  ;;  %2011 = vmatpush3.bf16.msra.mxu0 %v2248_v37  ;;  %v2273_v38 = vld [vmem:[#allocation3 + $0x298] sm:$0xff]  }
  0xd0   :  { %2032 = vmatprep.subr.bf16.mxu1 %v2252_v39  ;;  %v290_v49 = vmul.f32 %v288_v46, %v267_v35  ;;  %v299_v50 = vmul.f32 %v288_v46, %v263_v58  ;;  %v312_v52 = vmul.f32 %v288_v46, %v2550_v63  ;;  %2040 = vmatprep.subr.bf16.mxu0 %v2253_v62  ;;  %v2275_v62 = vld [vmem:[#allocation3 + $0x2e0] sm:$0xff]  }
  0xd1   :  { %v246_v40 = vpack.c.bf16 %v245_v43, %v245_v43 }
  0xd2   :  { %v291_v55 = vadd.f32 %v290_v49, %v285_v41  ;;  %v300_v57 = vadd.f32 %v299_v50, %v298_v31  ;;  %v313_v16 = vadd.f32 %v312_v52, %v311_v32  ;;  %1581 = vmatmul.mubr.bf16.vlgmr.msra.gmra.mrb[4].mxu0 %v1812_v53  ;;  %v2274_v41 = vld [vmem:[#allocation3 + $0x268] sm:$0xff]   ;;  %v2282_v50 = vld [vmem:[#allocation3 + $0x230] sm:$0xff]  }
  0xd3   :  { %247 = vst [vmem:[#allocation2 + $0x24] sm:$0xf] %v246_v40  ;;  %2033 = vmatpush3.bf16.msra.mxu1 %v2254_v45  ;;  %2041 = vmatpush3.bf16.msra.mxu0 %v2255_v48  ;;  %v2277_v45 = vld [vmem:[#allocation3 + $0x2a0] sm:$0xff]   ;;  %v2283_v49 = vld [vmem:[#allocation3 + $0x2a8] sm:$0xff]   ;;  %v2285_v52 = vld [vmem:[#allocation3 + $0x2f0] sm:$0xff]  }
  0xd4   :  { %v292_v1 = vmax.f32 %v291_v55, 0.0  ;;  %2062 = vmatprep.subr.bf16.mxu1 %v2257_v51  ;;  %v306_v58 = vadd.f32 %v305_v8, %v300_v57  ;;  %v315_v63 = vadd.f32 %v314_v47, %v313_v16  ;;  %v318_v10 = vpop.permute.xlu1 %317  ;;  %2042 = vmatprep.subr.bf16.mxu0 %v2256_v54  ;;  %v2281_v8 = vld [vmem:[#allocation3 + $0x2e8] sm:$0xff]   ;;  %v2280_v47 = vld [vmem:[#allocation3 + $0x270] sm:$0xff]   ;;  %v2284_v51 = vld [vmem:[#allocation3 + $0x278] sm:$0xff]  }
  0xd5   :  { %v320_v11 = vmul.f32 %v318_v10, %v267_v35  ;;  %v371_v35 = vrot.slane %v2529_v13, %v2451_v0  ;;  %v2276_v0 = vld [vmem:[#allocation3 + $0x228] sm:$0xff]   ;;  %v2287_v53 = vld [vmem:[#allocation3 + $0x2b0] sm:$0xff]   ;;  %v2286_v40 = vld [vmem:[#allocation3 + $0x238] sm:$0xff]  }
  0xd6   :  { %v293_v14 = vpack.c.bf16 %v292_v1, %v292_v1  ;;  %1621 = vmatmul.mubr.bf16.vlgmr.msra.gmra.mrb[4].mxu1 %v1814_v59  ;;  %v307_v15 = vmax.f32 %v306_v58, 0.0  ;;  %v2288_v54 = vld [vmem:[#allocation3 + $0x2f8] sm:$0xff]   ;;  %v2289_v55 = vld [vmem:[#allocation3 + $0x340] sm:$0xff]  }
  0xd7   :  { %2063 = vmatpush3.bf16.msra.mxu1 %v2259_v60  ;;  %v321_v17 = vadd.f32 %v320_v11, %v315_v63  ;;  %2043 = vmatpush3.bf16.msra.mxu0 %v2258_v5  ;;  %v2290_v16 = vld [vmem:[#allocation3 + $0x2b8] sm:$0xff]   ;;  %v2291_v60 = vld [vmem:[#allocation3 + $0x300] sm:$0xff]   ;;  %v2292_v63 = vld [vmem:[#allocation3 + $0x348] sm:$0xff]  }
  0xd8   :  { %294 = vst [vmem:[#allocation2 + $0x28] sm:$0xf] %v293_v14  ;;  %v308_v56 = vpack.c.bf16 %v307_v15, %v307_v15  ;;  %2064 = vmatprep.subr.bf16.mxu1 %v2261_v7  ;;  %2044 = vmatprep.subr.bf16.mxu0 %v2260_v44  ;;  %v2293_v59 = vld [vmem:[#allocation3 + $0x3c0] sm:$0xff]   ;;  %v2294_v11 = vld [vmem:[#allocation3 + $0x308] sm:$0xff]   ;;  %v2298_v15 = vld [vmem:[#allocation3 + $0x350] sm:$0xff]  }
  0xd9   :  { %v322_v25 = vmax.f32 %v321_v17, 0.0  ;;  %v327_v26 = vpop.permute.xlu1 %326  ;;  %v2297_v7 = vld [vmem:[#allocation3 + $0x380] sm:$0xff]   ;;  %v2299_v14 = vld [vmem:[#allocation3 + $0x3c8] sm:$0xff]   ;;  %v2303_v17 = vld [vmem:[#allocation3 + $0x3d0] sm:$0xff]  }
  0xda   :  { %309 = vst [vmem:[#allocation2 + $0x2c] sm:$0xf] %v308_v56  ;;  %v2587_v27 = vld [vmem:[#allocation2 + $0x20] sm:$0xff]  ;;  %v333_v2 = vmul.f32 %v332_v12, %v327_v26  ;;  %v2301_v12 = vld [vmem:[#allocation3 + $0x388] sm:$0xff]   ;;  %v2302_v56 = vld [vmem:[#allocation3 + $0x358] sm:$0xff]  }
  0xdb   :  { %2065 = vmatpush3.bf16.msra.mxu1 %v2263_v9  ;;  %v1817_v28 = vcombine.high %v2587_v27, %v2587_v27  ;;  %v323_v29 = vpack.c.bf16 %v322_v25, %v322_v25  ;;  %2045 = vmatpush3.bf16.msra.mxu0 %v2262_v18  ;;  %v1816_v58 = vcombine.low %v2587_v27, %v2587_v27  ;;  %v2300_v9 = vld [vmem:[#allocation3 + $0x310] sm:$0xff]   ;;  %v2309_v25 = vld [vmem:[#allocation3 + $0x398] sm:$0xff]   ;;  %v2308_v26 = vld [vmem:[#allocation3 + $0x320] sm:$0xff]  }
  0xdc   :  { %2066 = vmatprep.subr.bf16.mxu1 %v2267_v19  ;;  %v338_v61 = vadd.f32 %v337_v21, %v333_v2  ;;  %2046 = vmatprep.subr.bf16.mxu0 %v2264_v23  ;;  %v2305_v18 = vld [vmem:[#allocation3 + $0x390] sm:$0xff]   ;;  %v2304_v19 = vld [vmem:[#allocation3 + $0x318] sm:$0xff]   ;;  %v2306_v23 = vld [vmem:[#allocation3 + $0x360] sm:$0xff]  }
  0xdd   :  { %1660 = vmatprep.mubr.bf16.mxu0 %v1817_v28  ;;  %324 = vst [vmem:[#allocation2 + $0x30] sm:$0xf] %v323_v29  ;;  %v2307_v21 = vld [vmem:[#allocation3 + $0x3d8] sm:$0xff]   ;;  %v2311_v27 = vld [vmem:[#allocation3 + $0x3e0] sm:$0xff]   ;;  %v2310_v2 = vld [vmem:[#allocation3 + $0x368] sm:$0xff]  }
  0xde   :  { %v339_v36 = vmax.f32 %v338_v61, 0.0  ;;  %v361_v37 = vpop.permute.xlu1 %360  ;;  %v2313_v28 = vld [vmem:[#allocation3 + $0x3a0] sm:$0xff]   ;;  %v2315_v29 = vld [vmem:[#allocation3 + $0x3e8] sm:$0xff]   ;;  %v2319_v61 = vld [vmem:[#allocation3 + $0x3f0] sm:$0xff]  }
  0xdf   :  { %2067 = vmatpush3.bf16.msra.mxu1 %v2269_v20  ;;  %v367_v39 = vmul.f32 %v366_v30, %v361_v37  ;;  %2047 = vmatpush3.bf16.msra.mxu0 %v2268_v6  ;;  %v2312_v20 = vld [vmem:[#allocation3 + $0x328] sm:$0xff]   ;;  %v2314_v30 = vld [vmem:[#allocation3 + $0x370] sm:$0xff]   ;;  %v2322_v37 = vld [vmem:[#allocation3 + $0x3f8] sm:$0xff]  }
  0xe0   :  { %2068 = vmatprep.subr.bf16.mxu1 %v2271_v33  ;;  %v340_v42 = vpack.c.bf16 %v339_v36, %v339_v36  ;;  %2048 = vmatprep.subr.bf16.mxu0 %v2270_v34  ;;  %v2317_v6 = vld [vmem:[#allocation3 + $0x3a8] sm:$0xff]   ;;  %v2316_v33 = vld [vmem:[#allocation3 + $0x330] sm:$0xff]   ;;  %v2318_v34 = vld [vmem:[#allocation3 + $0x378] sm:$0xff]  }
  0xe1   :  { %v381_v31 = vld [vmem:[#allocation2 + $0x28] sm:$0xff]  ;;  %v372_v32 = vadd.f32 %v371_v35, %v367_v39  ;;  %v2321_v35 = vld [vmem:[#allocation3 + $0x3b0] sm:$0xff]   ;;  %v2320_v36 = vld [vmem:[#allocation3 + $0x338] sm:$0xff]  }
  0xe2   :  { %341 = vst [vmem:[#allocation2 + $0x34] sm:$0xf] %v340_v42  ;;  %v1819_v43 = vcombine.high %v381_v31, %v381_v31  ;;  %v1818_v44 = vcombine.low %v381_v31, %v381_v31 }
  0xe3   :  { %2069 = vmatpush3.bf16.msra.mxu1 %v2273_v38  ;;  %v373_v46 = vmax.f32 %v372_v32, 0.0  ;;  %2049 = vmatpush3.bf16.msra.mxu0 %v2272_v3  ;;  %v2323_v38 = vld [vmem:[#allocation3 + $0x3b8] sm:$0xff]  }
  0xe4   :  { %2070 = vmatprep.subr.bf16.mxu1 %v2275_v62  ;;  %2050 = vmatprep.subr.bf16.mxu0 %v2274_v41  ;;  %v643_v62 = vrot.slane %v2529_v13, %v2478_v22 }
  0xe5   :  { %1700 = vmatprep.mubr.bf16.mxu1 %v1819_v43  ;;  %v374_v48 = vpack.c.bf16 %v373_v46, %v373_v46 }
  0xe7   :  { %2071 = vmatpush3.bf16.msra.mxu1 %v2277_v45  ;;  %375 = vst [vmem:[#allocation2 + $0x3c] sm:$0xf] %v374_v48  ;;  %2051 = vmatpush3.bf16.msra.mxu0 %v2276_v0 }
  0xe8   :  { %2072 = vmatprep.subr.bf16.mxu1 %v2281_v8  ;;  %2052 = vmatprep.subr.bf16.mxu0 %v2280_v47 }
  0xe9   :  { %v2595_v57 = vld [vmem:[#allocation2 + $0x30] sm:$0xff] }
  0xea   :  { %v1821_v5 = vcombine.high %v2595_v57, %v2595_v57  ;;  %v1820_v39 = vcombine.low %v2595_v57, %v2595_v57 }
  0xeb   :  { %2073 = vmatpush3.bf16.msra.mxu1 %v2283_v49  ;;  %2053 = vmatpush3.bf16.msra.mxu0 %v2282_v50 }
  0xec   :  { %2074 = vmatprep.subr.bf16.mxu1 %v2285_v52  ;;  %2054 = vmatprep.subr.bf16.mxu0 %v2284_v51 }
  0xee   :  { %v2597_v1 = vld [vmem:[#allocation2 + $0x38] sm:$0xff] }
  0xef   :  { %2075 = vmatpush3.bf16.msra.mxu1 %v2287_v53  ;;  %2055 = vmatpush3.bf16.msra.mxu0 %v2286_v40  ;;  %v1823_v10 = vcombine.high %v2597_v1, %v2597_v1  ;;  %v1822_v3 = vcombine.low %v2597_v1, %v2597_v1 }
  0xf0   :  { %2076 = vmatprep.subr.bf16.mxu1 %v2288_v54  ;;  %2084 = vmatprep.subr.bf16.mxu0 %v2289_v55 }
  0xf2   :  { %1661 = vmatmul.mubr.bf16.vlgmr.msra.gmra.mrb[8].mxu0 %v1816_v58 }
  0xf3   :  { %2077 = vmatpush3.bf16.msra.mxu1 %v2290_v16  ;;  %2085 = vmatpush3.bf16.msra.mxu0 %v2291_v60 }
  0xf4   :  { %2106 = vmatprep.subr.bf16.mxu1 %v2293_v59  ;;  %2086 = vmatprep.subr.bf16.mxu0 %v2292_v63 }
  0xf5   :  { %1740 = vmatprep.mubr.bf16.mxu0 %v1821_v5 }
  0xf6   :  { %1701 = vmatmul.mubr.bf16.vlgmr.msra.gmra.mrb[8].mxu1 %v1818_v44 }
  0xf7   :  { %2107 = vmatpush3.bf16.msra.mxu1 %v2297_v7  ;;  %1780 = vmatprep.mubr.bf16.mxu1 %v1823_v10 }
  0xf8   :  { %2087 = vmatpush3.bf16.msra.mxu0 %v2294_v11  ;;  %2108 = vmatprep.subr.bf16.mxu1 %v2299_v14 }
  0xf9   :  { %2088 = vmatprep.subr.bf16.mxu0 %v2298_v15 }
  0xfb   :  { %2109 = vmatpush3.bf16.msra.mxu1 %v2301_v12 }
  0xfc   :  { %2089 = vmatpush3.bf16.msra.mxu0 %v2300_v9  ;;  %2110 = vmatprep.subr.bf16.mxu1 %v2303_v17 }
  0xfd   :  { %2090 = vmatprep.subr.bf16.mxu0 %v2302_v56 }
  0xff   :  { %2111 = vmatpush3.bf16.msra.mxu1 %v2305_v18 }
 0x100   :  { %2091 = vmatpush3.bf16.msra.mxu0 %v2304_v19  ;;  %2112 = vmatprep.subr.bf16.mxu1 %v2307_v21 }
 0x101   :  { %2092 = vmatprep.subr.bf16.mxu0 %v2306_v23 }
 0x103   :  { %2113 = vmatpush3.bf16.msra.mxu1 %v2309_v25 }
 0x104   :  { %2093 = vmatpush3.bf16.msra.mxu0 %v2308_v26  ;;  %2114 = vmatprep.subr.bf16.mxu1 %v2311_v27 }
 0x105   :  { %2094 = vmatprep.subr.bf16.mxu0 %v2310_v2 }
 0x107   :  { %2115 = vmatpush3.bf16.msra.mxu1 %v2313_v28 }
 0x108   :  { %2095 = vmatpush3.bf16.msra.mxu0 %v2312_v20  ;;  %2116 = vmatprep.subr.bf16.mxu1 %v2315_v29  ;;  %v1792_v29 = vrot.slane %v2529_v13, %v2489_v4 }
 0x109   :  { %2096 = vmatprep.subr.bf16.mxu0 %v2314_v30 }
 0x10b   :  { %2117 = vmatpush3.bf16.msra.mxu1 %v2317_v6 }
 0x10c   :  { %2097 = vmatpush3.bf16.msra.mxu0 %v2316_v33  ;;  %2118 = vmatprep.subr.bf16.mxu1 %v2319_v61  ;;  %v1799_v33 = vrot.slane %v2529_v13, %v2504_v24 }
 0x10d   :  { %2098 = vmatprep.subr.bf16.mxu0 %v2318_v34 }
 0x10f   :  { %2119 = vmatpush3.bf16.msra.mxu1 %v2321_v35 }
 0x110   :  { %2099 = vmatpush3.bf16.msra.mxu0 %v2320_v36  ;;  %2120 = vmatprep.subr.bf16.mxu1 %v2322_v37 }
 0x113   :  { %1741 = vmatmul.mubr.bf16.vlgmr.msra.gmra.mrb[12].mxu0 %v1820_v39  ;;  %2121 = vmatpush3.bf16.msra.mxu1 %v2323_v38 }
 0x116   :  { %1781 = vmatmul.mubr.bf16.vlgmr.msra.gmra.mrb[12].mxu1 %v1822_v3 }
 0x185   :  { %v1968_v42 = vpop.f32.mrb[0].mxu0 }
 0x186   :  { %v1969_v41 = vpop.f32.mrb[1].mxu0 }
 0x187   :  { %v1970_v31 = vadd.f32 %v1969_v41, %v1968_v42  ;;  %v1971_v32 = vpop.f32.mrb[2].mxu0 }
 0x188   :  { %v1972_v43 = vpop.f32.mrb[3].mxu0 }
 0x189   :  { %v1990_v45 = vpop.f32.mrb[0].mxu1  ;;  %v1503_v0 = vadd.f32 %v1970_v31, %v643_v62 }
 0x18a   :  { %v1991_v46 = vpop.f32.mrb[1].mxu1 }
 0x18b   :  { %v1992_v8 = vadd.f32 %v1991_v46, %v1990_v45  ;;  %v1993_v47 = vpop.f32.mrb[2].mxu1 }
 0x18c   :  { %v1994_v48 = vpop.f32.mrb[3].mxu1 }
 0x18d   :  { %v1543_v49 = vadd.f32 %v1992_v8, %v1503_v0 }
 0x1a5   :  { %v2012_v50 = vpop.f32.mrb[4].mxu0 }
 0x1a6   :  { %v2013_v52 = vpop.f32.mrb[5].mxu0 }
 0x1a7   :  { %v2014_v51 = vadd.f32 %v2013_v52, %v2012_v50  ;;  %v2015_v53 = vpop.f32.mrb[6].mxu0 }
 0x1a8   :  { %v2016_v40 = vpop.f32.mrb[7].mxu0 }
 0x1a9   :  { %v2034_v54 = vpop.f32.mrb[4].mxu1  ;;  %v1583_v55 = vadd.f32 %v2014_v51, %v1543_v49 }
 0x1aa   :  { %v2035_v57 = vpop.f32.mrb[5].mxu1 }
 0x1ab   :  { %v2036_v22 = vadd.f32 %v2035_v57, %v2034_v54  ;;  %v2037_v16 = vpop.f32.mrb[6].mxu1 }
 0x1ac   :  { %v2038_v60 = vpop.f32.mrb[7].mxu1 }
 0x1ad   :  { %v1623_v59 = vadd.f32 %v2036_v22, %v1583_v55 }
 0x1c5   :  { %v2056_v1 = vpop.f32.mrb[8].mxu0 }
 0x1c6   :  { %v2057_v58 = vpop.f32.mrb[9].mxu0 }
 0x1c7   :  { %v2058_v63 = vadd.f32 %v2057_v58, %v2056_v1  ;;  %v2059_v5 = vpop.f32.mrb[10].mxu0 }
 0x1c8   :  { %v2060_v7 = vpop.f32.mrb[11].mxu0 }
 0x1c9   :  { %v2078_v10 = vpop.f32.mrb[8].mxu1  ;;  %v1663_v44 = vadd.f32 %v2058_v63, %v1623_v59 }
 0x1ca   :  { %v2079_v11 = vpop.f32.mrb[9].mxu1 }
 0x1cb   :  { %v2080_v14 = vadd.f32 %v2079_v11, %v2078_v10  ;;  %v2081_v15 = vpop.f32.mrb[10].mxu1 }
 0x1cc   :  { %v2082_v12 = vpop.f32.mrb[11].mxu1 }
 0x1cd   :  { %v1703_v9 = vadd.f32 %v2080_v14, %v1663_v44 }
 0x1e6   :  { %v2100_v17 = vpop.f32.mrb[12].mxu0 }
 0x1e7   :  { %v2101_v56 = vpop.f32.mrb[13].mxu0 }
 0x1e8   :  { %v2102_v18 = vadd.f32 %v2101_v56, %v2100_v17  ;;  %v2103_v19 = vpop.f32.mrb[14].mxu0 }
 0x1e9   :  { %v2104_v21 = vpop.f32.mrb[15].mxu0  ;;  %v2122_v23 = vpop.f32.mrb[12].mxu1 }
 0x1ea   :  { %v1743_v25 = vadd.f32 %v2102_v18, %v1703_v9  ;;  %v2123_v26 = vpop.f32.mrb[13].mxu1 }
 0x1eb   :  { %v2124_v27 = vadd.f32 %v2123_v26, %v2122_v23  ;;  %v2125_v2 = vpop.f32.mrb[14].mxu1 }
 0x1ec   :  { %v2126_v28 = vpop.f32.mrb[15].mxu1 }
 0x1ed   :  { %v1783_v20 = vadd.f32 %v2124_v27, %v1743_v25 }
 0x1ef   :  { %v1788_v30 = vmax.f32 %v1783_v20, 0.0 }
 0x1f1   :  { %v1793_v6 = vmul.f32 %v1792_v29, %v1788_v30 }
 0x1f3   :  { %1794 = vadd.xlane.f32.xlu1 %v1793_v6 }
 0x280   :  { %v1795_v61 = vpop.xlane.xlu1 %1794 }
 0x281   :  { %v1800_v34 = vadd.f32 %v1799_v33, %v1795_v61 }
 0x283   :  { %1802 = vst.msk [vmem:[%s2621_s3] sm:$0xff] %vm1801_vm0, %v1800_v34 }
 0x284   :  { %1807 = vsyncpa [#allocation4], 1 }

</bundles_post_ra>
